<compile_context>
chip_gen: v6e
topology: v6e:2x2x1
jax: 0.10.0
libtpu: 0.0.40
codegen_flags: <defaults>
</compile_context>

<pallas_src>
import functools

import jax
import jax.numpy as jnp
from jax import lax
from jax.experimental import pallas as pl
from jax.experimental.pallas import tpu as pltpu

F32 = jnp.float32


def _dot_t(w, x):
    """(C_in, C_out) x (C_in, N) -> (C_out, N); contracts dim 0 of both (W^T @ x)."""
    return lax.dot_general(w, x, (((0,), (0,)), ((), ())),
                           preferred_element_type=F32)


# --------------------------------------------------------------------------
# Phase A: accumulate K^T V partial sums over N tiles (per split).
# --------------------------------------------------------------------------
def _ctx_kernel(C, cdt,
                x1_ref, x2_ref, x3_ref,
                cpw_ref, cpb_ref, kvw_ref,
                acc_ref):
    t = pl.program_id(2)

    @pl.when(t == 0)
    def _init():
        acc_ref[...] = jnp.zeros_like(acc_ref)

    def stream(i, x_ref):
        # channel-projection half (ReLU) feeding this stream's kv linear
        s = jnp.maximum(_dot_t(cpw_ref[i], x_ref[0].astype(cdt)) + cpb_ref[i], 0.0)
        s = s.astype(cdt)
        kv = _dot_t(kvw_ref[i], s).astype(cdt)          # (2C, tn): rows [:C]=k, [C:]=v
        k, v = kv[:C], kv[C:]
        # K^T V: contract the token (lane) dim of both -> (C, C), f32 accumulate
        # directly into the resident output block.
        acc_ref[0, 0, i] = acc_ref[0, 0, i] + lax.dot_general(
            k, v, (((1,), (1,)), ((), ())), preferred_element_type=F32)

    stream(0, x1_ref)   # ctx1: kv1(y1)
    stream(1, x2_ref)   # ctx2: kv2(y2)
    stream(2, x3_ref)   # ctx3: kv3(u3)  (segfeature)


# --------------------------------------------------------------------------
# Phase B: apply ctx to query streams, fused end_proj + residual + LayerNorm.
# --------------------------------------------------------------------------
def _apply_kernel(C, eps, cdt,
                  x1_ref, x2_ref, x3_ref, ctx12_ref, ctx3_ref,
                  cpw_ref, cpb_ref, epw_ref, vec_ref,
                  o1_ref, o2_ref):
    def proj(i, x_ref):
        p = _dot_t(cpw_ref[i], x_ref[0].astype(cdt)) + cpb_ref[i]
        return jnp.maximum(p, 0.0).astype(cdt)

    u1 = proj(0, x1_ref)          # queries for CrossAttention (stream 1)
    u2 = proj(1, x2_ref)          # queries for CrossAttention (stream 2)
    y3 = proj(2, x3_ref)          # query for CrossAttention2 (seg stream)

    ctx12 = ctx12_ref[0].astype(cdt)     # (C, 2C): [ctx1 | ctx2], row-softmaxed, f32 in HBM
    ctx3 = ctx3_ref[0].astype(cdt)       # (C, C)

    # q @ ctx (per-head, merged): out[e, n] = sum_d ctx[d, e] * q[d, n].
    z12 = _dot_t(ctx12, y3).astype(cdt)  # (2C, tn): rows [:C]=z1, [C:]=z2  (one matmul)
    v1 = _dot_t(ctx3, u1).astype(cdt)    # (C, tn)
    v2 = _dot_t(ctx3, u2).astype(cdt)

    # end_proj(cat([z, v])) as one K=2C matmul on the sublane-stacked value.
    cat1 = jnp.concatenate([z12[:C], v1], axis=0)       # (2C, tn)
    cat2 = jnp.concatenate([z12[C:], v2], axis=0)

    def layer_norm(r, w, b):     # LN over channels = sublane reduction
        mu = jnp.mean(r, axis=0, keepdims=True)
        d = r - mu
        var = jnp.mean(d * d, axis=0, keepdims=True)
        return d * lax.rsqrt(var + eps) * w + b

    # Re-read x tiles here (not at kernel top) to keep f32 live ranges short.
    r1 = x1_ref[0] + _dot_t(epw_ref[0], cat1) + vec_ref[0]
    o1_ref[0] = layer_norm(r1, vec_ref[2], vec_ref[3]).astype(o1_ref.dtype)
    r2 = x2_ref[0] + _dot_t(epw_ref[1], cat2) + vec_ref[1]
    o2_ref[0] = layer_norm(r2, vec_ref[4], vec_ref[5]).astype(o2_ref.dtype)


# --------------------------------------------------------------------------
# Wrapper
# --------------------------------------------------------------------------
def _vmem_capacity_bytes():
    try:
        info = pltpu.get_tpu_info()
        cap = getattr(info, "vmem_capacity_bytes", None)
        if cap:
            return int(cap)
    except Exception:
        pass
    return 64 * 1024 * 1024     # conservative fallback (v7x per-TensorCore VMEM)


def _pick_tile_n(N, C, out_bytes, budget_bytes):
    """Largest lane-dense tile whose double-buffered footprint fits the budget."""
    # Phase-B per-token-column footprint: 3 f32 inputs + 2 outputs, x2 buffers each.
    per_col = C * (3 * 2 * 4 + 2 * 2 * out_bytes)
    cap = max(128, budget_bytes // per_col)
    if N <= cap:
        return N                               # single tile: no reduction branching
    if N % 128 != 0:
        # TODO(synk): pad-and-mask path for huge non-128-multiple N; padded columns
        # are NOT neutral through bias+ReLU so they must be masked out of K^T V.
        return N
    for mult in (256, 128):                    # prefer 256-wide lanes (v6e/v7x MXU)
        tile = (cap // mult) * mult
        while tile >= mult:
            if N % tile == 0:
                return tile
            tile -= mult
    return 128


def feature_fusion_forward(x1_nchw, x2_nchw, seg_nchw, params, num_heads,
                           tile_n=None, compute_dtype=jnp.float32,
                           out_dtype=jnp.float32, vmem_limit_bytes=None):
    B, C, H, W = x1_nchw.shape
    N = H * W
    assert C % num_heads == 0
    hd = C // num_heads
    scale = hd ** (-0.5)
    cdt = compute_dtype
    out_bytes = jnp.dtype(out_dtype).itemsize

    phys_vmem = _vmem_capacity_bytes()
    if vmem_limit_bytes is None:
        vmem_limit_bytes = min(48 * 1024 * 1024, phys_vmem // 2)
    if tile_n is None:
        tile_n = _pick_tile_n(N, C, out_bytes, int(vmem_limit_bytes * 0.6))
    assert N % tile_n == 0
    nt = N // tile_n

    # Split the N reduction across two "parallel" programs so v7x's second
    # TensorCore has work in phase A even at B=1 (XLA sums the tiny partials).
    n_split = 2 if (nt >= 2 and nt % 2 == 0) else 1
    nt_ps = nt // n_split

    # Channel-major (B, C, N) is a pure reshape of NCHW (no HBM transpose).
    x1 = x1_nchw.reshape(B, C, N)
    x2 = x2_nchw.reshape(B, C, N)
    x3 = seg_nchw.reshape(B, C, N)

    col = lambda v: v.astype(F32).reshape(-1, 1)

    cp1_w, cp2_w, cp3_w = params["cp1_w"], params["cp2_w"], params["cp3_w"]
    cp1_b, cp2_b, cp3_b = params["cp1_b"], params["cp2_b"], params["cp3_b"]

    # Phase A packed weights: y-halves of cp1/cp2, u-half of cp3, kv projections.
    cpw_a = jnp.stack([cp1_w[:, :C], cp2_w[:, :C], cp3_w[:, C:]]).astype(cdt)    # (3,C,C)
    cpb_a = jnp.stack([col(cp1_b[:C]), col(cp2_b[:C]), col(cp3_b[C:])])          # (3,C,1)
    kvw = jnp.stack([params["kv1_w"], params["kv2_w"],
                     params["kv3_w"]]).astype(cdt)                               # (3,C,2C)

    # Phase B packed weights: u-halves of cp1/cp2, y-half of cp3, end_proj, vectors.
    cpw_b = jnp.stack([cp1_w[:, C:], cp2_w[:, C:], cp3_w[:, :C]]).astype(cdt)    # (3,C,C)
    cpb_b = jnp.stack([col(cp1_b[C:]), col(cp2_b[C:]), col(cp3_b[:C])])          # (3,C,1)
    epw = jnp.stack([params["ep1_w"], params["ep2_w"]]).astype(cdt)              # (2,2C,C)
    vecs = jnp.stack([col(params["ep1_b"]), col(params["ep2_b"]),
                      col(params["ln1_w"]), col(params["ln1_b"]),
                      col(params["ln2_w"]), col(params["ln2_b"])])               # (6,C,1)

    const_a = lambda a: pl.BlockSpec(a.shape, lambda b, s, t: (0,) * a.ndim)
    const_b = lambda a: pl.BlockSpec(a.shape, lambda b, t: (0,) * a.ndim)
    act_a = pl.BlockSpec((1, C, tile_n), lambda b, s, t: (b, 0, s * nt_ps + t))
    act_b = pl.BlockSpec((1, C, tile_n), lambda b, t: (b, 0, t))

    itemsize = jnp.dtype(cdt).itemsize

    # ---- Phase A: partial K^T V sums (reduction over N tiles, split for v7x) ----
    flops_a = 24 * B * N * C * C
    bytes_a = (3 * B * C * N * 4 + B * n_split * 3 * C * C * 4
               + int(cpw_a.size + kvw.size) * itemsize + int(cpb_a.size) * 4)
    partials = pl.pallas_call(
        functools.partial(_ctx_kernel, C, cdt),
        out_shape=jax.ShapeDtypeStruct((B, n_split, 3, C, C), F32),
        grid=(B, n_split, nt_ps),
        in_specs=[act_a, act_a, act_a,
                  const_a(cpw_a), const_a(cpb_a), const_a(kvw)],
        out_specs=pl.BlockSpec((1, 1, 3, C, C), lambda b, s, t: (b, s, 0, 0, 0)),
        compiler_params=pltpu.CompilerParams(
            dimension_semantics=("parallel", "parallel", "arbitrary"),
            vmem_limit_bytes=vmem_limit_bytes),
        cost_estimate=pl.CostEstimate(flops=flops_a, transcendentals=0,
                                      bytes_accessed=bytes_a),
    )(x1, x2, x3, cpw_a, cpb_a, kvw)

    # ---- Block-diagonal (per-head) softmax over rows, tiny -> plain XLA, f32 ----
    ctx_raw = partials.sum(axis=1)                            # (B, 3, C, C)
    head_id = jnp.arange(C) // hd
    on_block = head_id[:, None] == head_id[None, :]
    logits = jnp.where(on_block, ctx_raw * scale, -jnp.inf)
    ctx_sm = jax.nn.softmax(logits, axis=-2)                  # exact softmax over d (rows)
    ctx12 = jnp.concatenate([ctx_sm[:, 0], ctx_sm[:, 1]], axis=-1)   # (B, C, 2C), f32
    ctx3m = ctx_sm[:, 2]                                              # (B, C, C),  f32

    # ---- Phase B: apply ctx, fused end_proj + residual + LayerNorm ----
    flops_b = 22 * B * N * C * C
    bytes_b = ((3 * 4 + 2 * out_bytes) * B * C * N + B * 3 * C * C * 4
               + int(cpw_b.size + epw.size) * itemsize
               + int(cpb_b.size + vecs.size) * 4)
    o1, o2 = pl.pallas_call(
        functools.partial(_apply_kernel, C, 1e-5, cdt),
        out_shape=(jax.ShapeDtypeStruct((B, C, N), out_dtype),
                   jax.ShapeDtypeStruct((B, C, N), out_dtype)),
        grid=(B, nt),
        in_specs=[act_b, act_b, act_b,
                  pl.BlockSpec((1, C, 2 * C), lambda b, t: (b, 0, 0)),
                  pl.BlockSpec((1, C, C), lambda b, t: (b, 0, 0)),
                  const_b(cpw_b), const_b(cpb_b), const_b(epw), const_b(vecs)],
        out_specs=(act_b, act_b),
        compiler_params=pltpu.CompilerParams(
            dimension_semantics=("parallel", "parallel"),
            vmem_limit_bytes=vmem_limit_bytes),
        cost_estimate=pl.CostEstimate(flops=flops_b, transcendentals=2 * B * N,
                                      bytes_accessed=bytes_b),
    )(x1, x2, x3, ctx12, ctx3m, cpw_b, cpb_b, epw, vecs)

    return o1.reshape(B, C, H, W), o2.reshape(B, C, H, W)


# --------------------------------------------------------------------------
# Params + pure-JAX reference (validation)
# --------------------------------------------------------------------------
def init_params(key, dim):
    """Synthetic init: Linear weights ~ N(0, 0.02); biases / LN params get small
    random values so every bias-split / broadcast path is exercised.
    Weights stored (in, out) so the reference computes x @ W."""
    ks = jax.random.split(key, 16)
    w = lambda k, s, std=0.02: std * jax.random.normal(k, s, jnp.float32)
    return {
        "cp1_w": w(ks[0], (dim, 2 * dim)), "cp1_b": w(ks[1], (2 * dim,)),
        "cp2_w": w(ks[2], (dim, 2 * dim)), "cp2_b": w(ks[3], (2 * dim,)),
        "cp3_w": w(ks[4], (dim, 2 * dim)), "cp3_b": w(ks[5], (2 * dim,)),
        "kv1_w": w(ks[6], (dim, 2 * dim)),
        "kv2_w": w(ks[7], (dim, 2 * dim)),
        "kv3_w": w(ks[8], (dim, 2 * dim)),
        "ep1_w": w(ks[9], (2 * dim, dim)), "ep1_b": w(ks[10], (dim,)),
        "ep2_w": w(ks[11], (2 * dim, dim)), "ep2_b": w(ks[12], (dim,)),
        "ln1_w": 1.0 + w(ks[13], (dim,), 0.1), "ln1_b": w(ks[14], (dim,), 0.1),
        "ln2_w": 1.0 + w(ks[15], (dim,), 0.1), "ln2_b": jnp.zeros((dim,), jnp.float32),
    }


def reference_forward(x1_nchw, x2_nchw, seg_nchw, params, num_heads):
    """Pure-JAX replica of the PyTorch forward (token-major, per-head)."""
    B, C, H, W = x1_nchw.shape
    N = H * W
    hd = C // num_heads
    scale = hd ** (-0.5)
    to_bnc = lambda x: x.reshape(B, C, N).transpose(0, 2, 1)
    x1, x2, x3 = to_bnc(x1_nchw), to_bnc(x2_nchw), to_bnc(seg_nchw)

    lin = lambda x, w, b=None: (x @ w + b) if b is not None else x @ w
    split = lambda x: x.reshape(B, N, num_heads, hd).transpose(0, 2, 1, 3)
    merge = lambda x: x.transpose(0, 2, 1, 3).reshape(B, N, C)

    p1 = jax.nn.relu(lin(x1, params["cp1_w"], params["cp1_b"]))
    p2 = jax.nn.relu(lin(x2, params["cp2_w"], params["cp2_b"]))
    p3 = jax.nn.relu(lin(x3, params["cp3_w"], params["cp3_b"]))
    y1, u1 = p1[..., :C], p1[..., C:]
    y2, u2 = p2[..., :C], p2[..., C:]
    y3, u3 = p3[..., :C], p3[..., C:]

    def kv_split(x, w):
        kv = lin(x, w).reshape(B, N, 2, num_heads, hd).transpose(2, 0, 3, 1, 4)
        return kv[0], kv[1]

    def ctx_of(k, v):
        ctx = jnp.einsum("bhnd,bhne->bhde", k, v) * scale
        return jax.nn.softmax(ctx, axis=-2)

    k3, v3 = kv_split(u3, params["kv3_w"])
    ctx3 = ctx_of(k3, v3)
    v1a = merge(jnp.einsum("bhnd,bhde->bhne", split(u1), ctx3))
    v2a = merge(jnp.einsum("bhnd,bhde->bhne", split(u2), ctx3))
    k1, vv1 = kv_split(y1, params["kv1_w"])
    k2, vv2 = kv_split(y2, params["kv2_w"])
    ctx1, ctx2 = ctx_of(k1, vv1), ctx_of(k2, vv2)
    q3 = split(y3)
    z1a = merge(jnp.einsum("bhnd,bhde->bhne", q3, ctx1))
    z2a = merge(jnp.einsum("bhnd,bhde->bhne", q3, ctx2))

    cat1 = jnp.concatenate([z1a, v1a], axis=-1)
    cat2 = jnp.concatenate([z2a, v2a], axis=-1)
    r1 = x1 + lin(cat1, params["ep1_w"], params["ep1_b"])
    r2 = x2 + lin(cat2, params["ep2_w"], params["ep2_b"])

    def ln(r, w, b):
        mu = jnp.mean(r, axis=-1, keepdims=True)
        d = r - mu
        var = jnp.mean(d * d, axis=-1, keepdims=True)
        return d * jax.lax.rsqrt(var + 1e-5) * w + b

    o1 = ln(r1, params["ln1_w"], params["ln1_b"])
    o2 = ln(r2, params["ln2_w"], params["ln2_b"])
    to_nchw = lambda x: x.transpose(0, 2, 1).reshape(B, C, H, W)
    return to_nchw(o1), to_nchw(o2)


if __name__ == "__main__":
    B, C, H, W = 2, 32, 16, 16      # dim=32, N=256
    num_heads = 4                    # head_dim = 8

    key = jax.random.PRNGKey(0)
    k_in, k_p = jax.random.split(key)
    kx1, kx2, kx3 = jax.random.split(k_in, 3)
    x1 = jax.random.normal(kx1, (B, C, H, W), jnp.float32)
    x2 = jax.random.normal(kx2, (B, C, H, W), jnp.float32)
    seg = jax.random.normal(kx3, (B, C, H, W), jnp.float32)
    params = init_params(k_p, C)

    r1, r2 = reference_forward(x1, x2, seg, params, num_heads)

    # Auto tile: tile_n == N, nt == 1 (single-tile fast path, no reduction branching).
    o1, o2 = feature_fusion_forward(x1, x2, seg, params, num_heads)
    jax.block_until_ready((o1, o2))
    assert o1.shape == (B, C, H, W) and o2.shape == (B, C, H, W)
    assert jnp.allclose(o1, r1, atol=2e-3, rtol=2e-3), "x1 output mismatch (auto tile)"
    assert jnp.allclose(o2, r2, atol=2e-3, rtol=2e-3), "x2 output mismatch (auto tile)"

    # Multi-tile + split-reduction path (nt=2 -> n_split=2 partial accumulators).
    t1, t2 = feature_fusion_forward(x1, x2, seg, params, num_heads, tile_n=128)
    jax.block_until_ready((t1, t2))
    assert jnp.allclose(t1, r1, atol=2e-3, rtol=2e-3), "x1 output mismatch (tiled)"
    assert jnp.allclose(t2, r2, atol=2e-3, rtol=2e-3), "x2 output mismatch (tiled)"

    # bf16-operand / f32-accumulate path (v6e / v7x MXU-native operands).
    b1, b2 = feature_fusion_forward(x1, x2, seg, params, num_heads,
                                    tile_n=128, compute_dtype=jnp.bfloat16)
    jax.block_until_ready((b1, b2))
    assert jnp.allclose(b1, r1, atol=3e-2, rtol=3e-2), "x1 output mismatch (bf16)"
    assert jnp.allclose(b2, r2, atol=3e-2, rtol=3e-2), "x2 output mismatch (bf16)"

    print("KERNEL_OK")
</pallas_src>

<mosaic_0001>
module attributes {stable_mosaic.version = 11 : i64} {
  func.func @_ctx_kernel(%arg0: i32, %arg1: i32, %arg2: i32, %arg3: memref<1x32x256xf32, #tpu.memory_space<vmem>>, %arg4: memref<1x32x256xf32, #tpu.memory_space<vmem>>, %arg5: memref<1x32x256xf32, #tpu.memory_space<vmem>>, %arg6: memref<3x32x32xf32, #tpu.memory_space<vmem>>, %arg7: memref<3x32x1xf32, #tpu.memory_space<vmem>>, %arg8: memref<3x32x64xf32, #tpu.memory_space<vmem>>, %arg9: memref<1x1x3x32x32xf32, #tpu.memory_space<vmem>>) attributes {dimension_semantics = [#tpu.dimension_semantics<parallel>, #tpu.dimension_semantics<parallel>, #tpu.dimension_semantics<arbitrary>], iteration_bounds = array<i64: 2, 1, 1>, scalar_prefetch = 0 : i64, scratch_operands = 0 : i64, tpu.core_type = #tpu.core_type<tc>, window_params = [{transform_indices = @transform_0, window_bounds = array<i64: 1, 32, 256>}, {transform_indices = @transform_1, window_bounds = array<i64: 1, 32, 256>}, {transform_indices = @transform_2, window_bounds = array<i64: 1, 32, 256>}, {pipeline_mode = #tpu.pipeline_mode<synchronous>, transform_indices = @transform_3, window_bounds = array<i64: 3, 32, 32>}, {pipeline_mode = #tpu.pipeline_mode<synchronous>, transform_indices = @transform_4, window_bounds = array<i64: 3, 32, 1>}, {pipeline_mode = #tpu.pipeline_mode<synchronous>, transform_indices = @transform_5, window_bounds = array<i64: 3, 32, 64>}, {transform_indices = @transform_6, window_bounds = array<i64: 1, 1, 3, 32, 32>}]} {
    %c0_i32 = arith.constant 0 : i32
    %0 = arith.cmpi eq, %arg2, %c0_i32 : i32
    %1 = arith.extui %0 : i1 to i32
    %c0_i32_0 = arith.constant 0 : i32
    %2 = arith.cmpi ne, %1, %c0_i32_0 : i32
    scf.if %2 {
      %cst_75 = arith.constant 0.000000e+00 : f32
      %72 = vector.broadcast %cst_75 : f32 to vector<1x1x3x32x32xf32>
      %c0_76 = arith.constant 0 : index
      %c0_77 = arith.constant 0 : index
      %c0_78 = arith.constant 0 : index
      %c0_79 = arith.constant 0 : index
      %c0_80 = arith.constant 0 : index
      %73 = vector.load %arg9[%c0_76, %c0_77, %c0_78, %c0_79, %c0_80] : memref<1x1x3x32x32xf32, #tpu.memory_space<vmem>>, vector<1x1x3x32x32xf32>
      tpu.vector_store %arg9[%c0_76, %c0_77, %c0_78, %c0_79, %c0_80], %72 {strides = array<i32>} : memref<1x1x3x32x32xf32, #tpu.memory_space<vmem>>, vector<1x1x3x32x32xf32>,
    } else {
    }
    %c0 = arith.constant 0 : index
    %c0_1 = arith.constant 0 : index
    %c0_2 = arith.constant 0 : index
    %3 = vector.load %arg6[%c0, %c0_1, %c0_2] : memref<3x32x32xf32, #tpu.memory_space<vmem>>, vector<1x32x32xf32>
    %4 = vector.shape_cast %3 : vector<1x32x32xf32> to vector<32x32xf32>
    %c0_3 = arith.constant 0 : index
    %c0_4 = arith.constant 0 : index
    %c0_5 = arith.constant 0 : index
    %5 = vector.load %arg3[%c0_3, %c0_4, %c0_5] : memref<1x32x256xf32, #tpu.memory_space<vmem>>, vector<1x32x256xf32>
    %6 = vector.shape_cast %5 : vector<1x32x256xf32> to vector<32x256xf32>
    %cst = arith.constant dense<0.000000e+00> : vector<32x256xf32>
    %7 = tpu.matmul %4, %6, %cst {dimension_numbers = #tpu.dot_dimension_numbers<[0], [0], [1], [1], [0, 1, 1, 1], [], []>} : vector<32x32xf32>, vector<32x256xf32>, vector<32x256xf32> -> vector<32x256xf32>
    %c0_6 = arith.constant 0 : index
    %c0_7 = arith.constant 0 : index
    %c0_8 = arith.constant 0 : index
    %8 = vector.load %arg7[%c0_6, %c0_7, %c0_8] : memref<3x32x1xf32, #tpu.memory_space<vmem>>, vector<1x32x1xf32>
    %9 = vector.shape_cast %8 : vector<1x32x1xf32> to vector<32x1xf32>
    %10 = vector.broadcast %9 : vector<32x1xf32> to vector<32x256xf32>
    %11 = arith.addf %7, %10 : vector<32x256xf32>
    %cst_9 = arith.constant 0.000000e+00 : f32
    %12 = vector.broadcast %cst_9 : f32 to vector<32x256xf32>
    %13 = arith.maximumf %11, %12 : vector<32x256xf32>
    %c0_10 = arith.constant 0 : index
    %c0_11 = arith.constant 0 : index
    %c0_12 = arith.constant 0 : index
    %14 = vector.load %arg8[%c0_10, %c0_11, %c0_12] : memref<3x32x64xf32, #tpu.memory_space<vmem>>, vector<1x32x64xf32>
    %15 = vector.shape_cast %14 : vector<1x32x64xf32> to vector<32x64xf32>
    %cst_13 = arith.constant dense<0.000000e+00> : vector<64x256xf32>
    %16 = tpu.matmul %15, %13, %cst_13 {dimension_numbers = #tpu.dot_dimension_numbers<[0], [0], [1], [1], [0, 1, 1, 1], [], []>} : vector<32x64xf32>, vector<32x256xf32>, vector<64x256xf32> -> vector<64x256xf32>
    %17 = vector.extract_strided_slice %16 {offsets = [0, 0], sizes = [32, 256], strides = [1, 1]} : vector<64x256xf32> to vector<32x256xf32>
    %18 = vector.extract_strided_slice %16 {offsets = [32, 0], sizes = [32, 256], strides = [1, 1]} : vector<64x256xf32> to vector<32x256xf32>
    %c0_14 = arith.constant 0 : index
    %c0_15 = arith.constant 0 : index
    %c0_16 = arith.constant 0 : index
    %c0_17 = arith.constant 0 : index
    %c0_18 = arith.constant 0 : index
    %19 = vector.load %arg9[%c0_14, %c0_15, %c0_16, %c0_17, %c0_18] : memref<1x1x3x32x32xf32, #tpu.memory_space<vmem>>, vector<1x1x1x32x32xf32>
    %20 = vector.shape_cast %19 : vector<1x1x1x32x32xf32> to vector<32x32xf32>
    %cst_19 = arith.constant dense<0.000000e+00> : vector<32x32xf32>
    %21 = tpu.matmul %17, %18, %cst_19 {dimension_numbers = #tpu.dot_dimension_numbers<[1], [1], [0], [0], [0, 0, 1, 0], [], []>} : vector<32x256xf32>, vector<32x256xf32>, vector<32x32xf32> -> vector<32x32xf32>
    %22 = arith.addf %20, %21 : vector<32x32xf32>
    %c0_20 = arith.constant 0 : index
    %c0_21 = arith.constant 0 : index
    %c0_22 = arith.constant 0 : index
    %c0_23 = arith.constant 0 : index
    %c0_24 = arith.constant 0 : index
    %23 = vector.load %arg9[%c0_20, %c0_21, %c0_22, %c0_23, %c0_24] : memref<1x1x3x32x32xf32, #tpu.memory_space<vmem>>, vector<1x1x1x32x32xf32>
    %24 = vector.shape_cast %23 : vector<1x1x1x32x32xf32> to vector<32x32xf32>
    %25 = vector.shape_cast %22 : vector<32x32xf32> to vector<1x1x1x32x32xf32>
    tpu.vector_store %arg9[%c0_20, %c0_21, %c0_22, %c0_23, %c0_24], %25 {strides = array<i32>} : memref<1x1x3x32x32xf32, #tpu.memory_space<vmem>>, vector<1x1x1x32x32xf32>,
    %c1 = arith.constant 1 : index
    %c0_25 = arith.constant 0 : index
    %c0_26 = arith.constant 0 : index
    %26 = vector.load %arg6[%c1, %c0_25, %c0_26] : memref<3x32x32xf32, #tpu.memory_space<vmem>>, vector<1x32x32xf32>
    %27 = vector.shape_cast %26 : vector<1x32x32xf32> to vector<32x32xf32>
    %c0_27 = arith.constant 0 : index
    %c0_28 = arith.constant 0 : index
    %c0_29 = arith.constant 0 : index
    %28 = vector.load %arg4[%c0_27, %c0_28, %c0_29] : memref<1x32x256xf32, #tpu.memory_space<vmem>>, vector<1x32x256xf32>
    %29 = vector.shape_cast %28 : vector<1x32x256xf32> to vector<32x256xf32>
    %cst_30 = arith.constant dense<0.000000e+00> : vector<32x256xf32>
    %30 = tpu.matmul %27, %29, %cst_30 {dimension_numbers = #tpu.dot_dimension_numbers<[0], [0], [1], [1], [0, 1, 1, 1], [], []>} : vector<32x32xf32>, vector<32x256xf32>, vector<32x256xf32> -> vector<32x256xf32>
    %c1_31 = arith.constant 1 : index
    %c0_32 = arith.constant 0 : index
    %c0_33 = arith.constant 0 : index
    %31 = vector.load %arg7[%c1_31, %c0_32, %c0_33] : memref<3x32x1xf32, #tpu.memory_space<vmem>>, vector<1x32x1xf32>
    %32 = vector.shape_cast %31 : vector<1x32x1xf32> to vector<32x1xf32>
    %33 = vector.broadcast %32 : vector<32x1xf32> to vector<32x256xf32>
    %34 = arith.addf %30, %33 : vector<32x256xf32>
    %cst_34 = arith.constant 0.000000e+00 : f32
    %35 = vector.broadcast %cst_34 : f32 to vector<32x256xf32>
    %36 = arith.maximumf %34, %35 : vector<32x256xf32>
    %c1_35 = arith.constant 1 : index
    %c0_36 = arith.constant 0 : index
    %c0_37 = arith.constant 0 : index
    %37 = vector.load %arg8[%c1_35, %c0_36, %c0_37] : memref<3x32x64xf32, #tpu.memory_space<vmem>>, vector<1x32x64xf32>
    %38 = vector.shape_cast %37 : vector<1x32x64xf32> to vector<32x64xf32>
    %cst_38 = arith.constant dense<0.000000e+00> : vector<64x256xf32>
    %39 = tpu.matmul %38, %36, %cst_38 {dimension_numbers = #tpu.dot_dimension_numbers<[0], [0], [1], [1], [0, 1, 1, 1], [], []>} : vector<32x64xf32>, vector<32x256xf32>, vector<64x256xf32> -> vector<64x256xf32>
    %40 = vector.extract_strided_slice %39 {offsets = [0, 0], sizes = [32, 256], strides = [1, 1]} : vector<64x256xf32> to vector<32x256xf32>
    %41 = vector.extract_strided_slice %39 {offsets = [32, 0], sizes = [32, 256], strides = [1, 1]} : vector<64x256xf32> to vector<32x256xf32>
    %c0_39 = arith.constant 0 : index
    %c0_40 = arith.constant 0 : index
    %c1_41 = arith.constant 1 : index
    %c0_42 = arith.constant 0 : index
    %c0_43 = arith.constant 0 : index
    %42 = vector.load %arg9[%c0_39, %c0_40, %c1_41, %c0_42, %c0_43] : memref<1x1x3x32x32xf32, #tpu.memory_space<vmem>>, vector<1x1x1x32x32xf32>
    %43 = vector.shape_cast %42 : vector<1x1x1x32x32xf32> to vector<32x32xf32>
    %cst_44 = arith.constant dense<0.000000e+00> : vector<32x32xf32>
    %44 = tpu.matmul %40, %41, %cst_44 {dimension_numbers = #tpu.dot_dimension_numbers<[1], [1], [0], [0], [0, 0, 1, 0], [], []>} : vector<32x256xf32>, vector<32x256xf32>, vector<32x32xf32> -> vector<32x32xf32>
    %45 = arith.addf %43, %44 : vector<32x32xf32>
    %c0_45 = arith.constant 0 : index
    %c0_46 = arith.constant 0 : index
    %c1_47 = arith.constant 1 : index
    %c0_48 = arith.constant 0 : index
    %c0_49 = arith.constant 0 : index
    %46 = vector.load %arg9[%c0_45, %c0_46, %c1_47, %c0_48, %c0_49] : memref<1x1x3x32x32xf32, #tpu.memory_space<vmem>>, vector<1x1x1x32x32xf32>
    %47 = vector.shape_cast %46 : vector<1x1x1x32x32xf32> to vector<32x32xf32>
    %48 = vector.shape_cast %45 : vector<32x32xf32> to vector<1x1x1x32x32xf32>
    tpu.vector_store %arg9[%c0_45, %c0_46, %c1_47, %c0_48, %c0_49], %48 {strides = array<i32>} : memref<1x1x3x32x32xf32, #tpu.memory_space<vmem>>, vector<1x1x1x32x32xf32>,
    %c2 = arith.constant 2 : index
    %c0_50 = arith.constant 0 : index
    %c0_51 = arith.constant 0 : index
    %49 = vector.load %arg6[%c2, %c0_50, %c0_51] : memref<3x32x32xf32, #tpu.memory_space<vmem>>, vector<1x32x32xf32>
    %50 = vector.shape_cast %49 : vector<1x32x32xf32> to vector<32x32xf32>
    %c0_52 = arith.constant 0 : index
    %c0_53 = arith.constant 0 : index
    %c0_54 = arith.constant 0 : index
    %51 = vector.load %arg5[%c0_52, %c0_53, %c0_54] : memref<1x32x256xf32, #tpu.memory_space<vmem>>, vector<1x32x256xf32>
    %52 = vector.shape_cast %51 : vector<1x32x256xf32> to vector<32x256xf32>
    %cst_55 = arith.constant dense<0.000000e+00> : vector<32x256xf32>
    %53 = tpu.matmul %50, %52, %cst_55 {dimension_numbers = #tpu.dot_dimension_numbers<[0], [0], [1], [1], [0, 1, 1, 1], [], []>} : vector<32x32xf32>, vector<32x256xf32>, vector<32x256xf32> -> vector<32x256xf32>
    %c2_56 = arith.constant 2 : index
    %c0_57 = arith.constant 0 : index
    %c0_58 = arith.constant 0 : index
    %54 = vector.load %arg7[%c2_56, %c0_57, %c0_58] : memref<3x32x1xf32, #tpu.memory_space<vmem>>, vector<1x32x1xf32>
    %55 = vector.shape_cast %54 : vector<1x32x1xf32> to vector<32x1xf32>
    %56 = vector.broadcast %55 : vector<32x1xf32> to vector<32x256xf32>
    %57 = arith.addf %53, %56 : vector<32x256xf32>
    %cst_59 = arith.constant 0.000000e+00 : f32
    %58 = vector.broadcast %cst_59 : f32 to vector<32x256xf32>
    %59 = arith.maximumf %57, %58 : vector<32x256xf32>
    %c2_60 = arith.constant 2 : index
    %c0_61 = arith.constant 0 : index
    %c0_62 = arith.constant 0 : index
    %60 = vector.load %arg8[%c2_60, %c0_61, %c0_62] : memref<3x32x64xf32, #tpu.memory_space<vmem>>, vector<1x32x64xf32>
    %61 = vector.shape_cast %60 : vector<1x32x64xf32> to vector<32x64xf32>
    %cst_63 = arith.constant dense<0.000000e+00> : vector<64x256xf32>
    %62 = tpu.matmul %61, %59, %cst_63 {dimension_numbers = #tpu.dot_dimension_numbers<[0], [0], [1], [1], [0, 1, 1, 1], [], []>} : vector<32x64xf32>, vector<32x256xf32>, vector<64x256xf32> -> vector<64x256xf32>
    %63 = vector.extract_strided_slice %62 {offsets = [0, 0], sizes = [32, 256], strides = [1, 1]} : vector<64x256xf32> to vector<32x256xf32>
    %64 = vector.extract_strided_slice %62 {offsets = [32, 0], sizes = [32, 256], strides = [1, 1]} : vector<64x256xf32> to vector<32x256xf32>
    %c0_64 = arith.constant 0 : index
    %c0_65 = arith.constant 0 : index
    %c2_66 = arith.constant 2 : index
    %c0_67 = arith.constant 0 : index
    %c0_68 = arith.constant 0 : index
    %65 = vector.load %arg9[%c0_64, %c0_65, %c2_66, %c0_67, %c0_68] : memref<1x1x3x32x32xf32, #tpu.memory_space<vmem>>, vector<1x1x1x32x32xf32>
    %66 = vector.shape_cast %65 : vector<1x1x1x32x32xf32> to vector<32x32xf32>
    %cst_69 = arith.constant dense<0.000000e+00> : vector<32x32xf32>
    %67 = tpu.matmul %63, %64, %cst_69 {dimension_numbers = #tpu.dot_dimension_numbers<[1], [1], [0], [0], [0, 0, 1, 0], [], []>} : vector<32x256xf32>, vector<32x256xf32>, vector<32x32xf32> -> vector<32x32xf32>
    %68 = arith.addf %66, %67 : vector<32x32xf32>
    %c0_70 = arith.constant 0 : index
    %c0_71 = arith.constant 0 : index
    %c2_72 = arith.constant 2 : index
    %c0_73 = arith.constant 0 : index
    %c0_74 = arith.constant 0 : index
    %69 = vector.load %arg9[%c0_70, %c0_71, %c2_72, %c0_73, %c0_74] : memref<1x1x3x32x32xf32, #tpu.memory_space<vmem>>, vector<1x1x1x32x32xf32>
    %70 = vector.shape_cast %69 : vector<1x1x1x32x32xf32> to vector<32x32xf32>
    %71 = vector.shape_cast %68 : vector<32x32xf32> to vector<1x1x1x32x32xf32>
    tpu.vector_store %arg9[%c0_70, %c0_71, %c2_72, %c0_73, %c0_74], %71 {strides = array<i32>} : memref<1x1x3x32x32xf32, #tpu.memory_space<vmem>>, vector<1x1x1x32x32xf32>,
    return
  }
  func.func @transform_0(%arg0: i32, %arg1: i32, %arg2: i32) -> (i32, i32, i32) {
    %c1_i32 = arith.constant 1 : i32
    %0 = arith.muli %arg1, %c1_i32 : i32
    %1 = arith.addi %0, %arg2 : i32
    %c0_i32 = arith.constant 0 : i32
    %c0_i32_0 = arith.constant 0 : i32
    return %arg0, %c0_i32, %1 : i32, i32, i32
  }
  func.func @transform_1(%arg0: i32, %arg1: i32, %arg2: i32) -> (i32, i32, i32) {
    %c1_i32 = arith.constant 1 : i32
    %0 = arith.muli %arg1, %c1_i32 : i32
    %1 = arith.addi %0, %arg2 : i32
    %c0_i32 = arith.constant 0 : i32
    %c0_i32_0 = arith.constant 0 : i32
    return %arg0, %c0_i32, %1 : i32, i32, i32
  }
  func.func @transform_2(%arg0: i32, %arg1: i32, %arg2: i32) -> (i32, i32, i32) {
    %c1_i32 = arith.constant 1 : i32
    %0 = arith.muli %arg1, %c1_i32 : i32
    %1 = arith.addi %0, %arg2 : i32
    %c0_i32 = arith.constant 0 : i32
    %c0_i32_0 = arith.constant 0 : i32
    return %arg0, %c0_i32, %1 : i32, i32, i32
  }
  func.func @transform_3(%arg0: i32, %arg1: i32, %arg2: i32) -> (i32, i32, i32) {
    %c0_i32 = arith.constant 0 : i32
    %c0_i32_0 = arith.constant 0 : i32
    %c0_i32_1 = arith.constant 0 : i32
    %c0_i32_2 = arith.constant 0 : i32
    return %c0_i32, %c0_i32_0, %c0_i32_1 : i32, i32, i32
  }
  func.func @transform_4(%arg0: i32, %arg1: i32, %arg2: i32) -> (i32, i32, i32) {
    %c0_i32 = arith.constant 0 : i32
    %c0_i32_0 = arith.constant 0 : i32
    %c0_i32_1 = arith.constant 0 : i32
    %c0_i32_2 = arith.constant 0 : i32
    return %c0_i32, %c0_i32_0, %c0_i32_1 : i32, i32, i32
  }
  func.func @transform_5(%arg0: i32, %arg1: i32, %arg2: i32) -> (i32, i32, i32) {
    %c0_i32 = arith.constant 0 : i32
    %c0_i32_0 = arith.constant 0 : i32
    %c0_i32_1 = arith.constant 0 : i32
    %c0_i32_2 = arith.constant 0 : i32
    return %c0_i32, %c0_i32_0, %c0_i32_1 : i32, i32, i32
  }
  func.func @transform_6(%arg0: i32, %arg1: i32, %arg2: i32) -> (i32, i32, i32, i32, i32) {
    %c0_i32 = arith.constant 0 : i32
    %c0_i32_0 = arith.constant 0 : i32
    %c0_i32_1 = arith.constant 0 : i32
    %c0_i32_2 = arith.constant 0 : i32
    return %arg0, %arg1, %c0_i32, %c0_i32_0, %c0_i32_1 : i32, i32, i32, i32, i32
  }
}

</mosaic_0001>

<bundles_post_ra>
// kernel: tpu_custom_call.1
= control target key start
LH: loop header
LB: loop body
LE: loop exit
PB: predicated region body
PF: predicated region fallthrough
CT: control target
= control target key end

     0   :  { %s2869_s0 = inlined_call_operand.hbm [shape: f32[2,32,256], index: 0, kind: input, shape index: {}]   ;;  %s2870_s1 = inlined_call_operand.hbm [shape: f32[2,32,256], index: 1, kind: input, shape index: {}]   ;;  %s2871_s2 = inlined_call_operand.hbm [shape: f32[2,32,256], index: 2, kind: input, shape index: {}]   ;;  %s2872_s3 = inlined_call_operand.vmem [shape: f32[3,32,32], index: 3, kind: input, shape index: {}]   ;;  %s2873_s4 = inlined_call_operand.vmem [shape: f32[3,32,1], index: 4, kind: input, shape index: {}]   ;;  %s2874_s5 = inlined_call_operand.hbm [shape: f32[3,32,64], index: 5, kind: input, shape index: {}]   ;;  %s2875_s6 = inlined_call_operand.hbm [shape: f32[2,1,3,32,32], index: 6, kind: output, shape index: {}]  }
   0x1   :  { %2888 = sst [smem:[#allocation20_spill]] %s2869_s0 }
   0x2   :  { %2889 = sst [smem:[#allocation21_spill]] %s2870_s1 }
   0x3   :  { %11 = vsyncpa [#allocation3], 0 }
   0x4   :  { %13 = vsyncpa [#allocation3 + $0x1], 0 }
   0x5   :  { %14 = vsyncpa [#allocation6], 0 }
   0x6   :  { %16 = vsyncpa [#allocation6 + $0x1], 0 }
   0x7   :  { %17 = vsyncpa [#allocation9], 0 }
   0x8   :  { %18 = vsyncpa [#allocation4], 0 }
   0x9   :  { %20 = vsyncpa [#allocation4 + $0x1], 0  ;;  %s2381_s21 = smov 0   ;;  %s2383_s22 = smov 0  }
   0xa   :  { %s2385_s23 = smov 0   ;;  %s2387_s24 = smov 0  }
   0xb   :  { %s2389_s25 = smov 0   ;;  %s2391_s26 = smov 0  }
   0xc LB: > { %2890 = sst [smem:[#allocation15_spill]] %s2327_s25  ;;  %s45_s27 = sadd.s32 1, %s2327_s25  ;;  %s2331_s26 = sphi %s2391_s26, %s26_s26   ;;  %s2327_s25 = sphi %s2389_s25, %s2916_s25   ;;  %s2323_s24 = sphi %s2387_s24, %s2915_s24   ;;  %s2319_s23 = sphi %s2385_s23, %s2919_s23   ;;  %s2315_s22 = sphi %s2383_s22, %s2918_s22   ;;  %s2311_s21 = sphi %s2381_s21, %s2917_s21  }
   0xd   : > { %2891 = sst [smem:[#allocation16_spill]] %s2331_s26  ;;  %s56_s28 = sadd.s32 1, %s2319_s23 }
   0xe   : > { %p47_p0 = scmp.ge.s32.totalorder %s45_s27, 2  ;;  %p63_p1 = scmp.ne.s32.totalorder %s2319_s23, %s2315_s22 }
   0xf   : > { %p64_p2 = scmp.eq.s32.totalorder %s2331_s26, 0  ;;  %p2071_p5 = scmp.lt.s32.totalorder %s2331_s26, 2 }
  0x10   : > { %s2921_s27 = smov (%p47_p0, %s45_s27), 0  ;;  %s2880_s30 = sand.u32 1, %s2319_s23  }
  0x11   : > { %2892 = sst [smem:[#allocation17_spill]] %s2921_s27  ;;  %p65_p4 = por %p64_p2, %p63_p1 }
  0x12   : > { %s51_s29 = ssub.s32 %s2327_s25, %s2921_s27  ;;  %s2428_s7 = sshll.u32 %s2880_s30, 6 }
  0x13   : > { %p54_p6 = scmp.eq.s32.totalorder %s51_s29, 0  ;;  %s2431_s8 = sshll.u32 %s2327_s25, 10 }
  0x14   : > { %p2433_p7 = pnand %p2071_p5, %p65_p4  ;;  %s287_s11 = sand.u32 1, %s2331_s26  }
  0x15   : > { %s2438_s10 = scalar_select %p54_p6, %s2319_s23, %s56_s28  }
  0x16   : > { %s2895_s1 = sld [smem:[#allocation21_spill]]  ;;  %s291_s15 = scalar_lea.vmem [#allocation5], %s2428_s7 }
  0x17   : > { %2894 = sst [smem:[#allocation18_spill]] %s2438_s10  ;;  %s301_s16 = sshll.u32 %s291_s15, 4  ;;  %s302_s16 = int_to_ptr.vmem [resolvable:$true] %s301_s16 }
  0x18   : > { %s2446_s17 = scalar_lea.sflag [#allocation6], %s287_s11  ;;  %p2882_p8 = pneg %p2433_p7 }
  0x19   : > { %s2146_s18 = scalar_lea.vmem %s302_s16, 1024  ;;  %s2333_s19 = smov [#allocation5]  }
  0x1a   : > { %p2147_p9 = scmp.ne.s32.totalorder %s302_s16, %s2146_s18  ;;  %s2151_s20 = sshll.u32 %s2333_s19, 4  ;;  %s2152_s20 = int_to_ptr.vmem [resolvable:$false] %s2151_s20 }
  0x1b   : > { %s2153_s28 = scalar_lea.vmem %s2152_s20, 2048  ;;  %p2154_p12 = scmp.lt.s32.totalorder %s302_s16, %s2152_s20 }
  0x1c   : > { %s300_s14 = scalar_lea.hbm %s2895_s1, %s2431_s8  ;;  %p2149_p10 = pnand %p2147_p9, %p2882_p8 }
  0x1d   : > { %p2155_p13 = scmp.lt.s32.totalorder %s2153_s28, %s2146_s18 }
  0x1e   : > { %p2150_p11 = pneg %p2149_p10 }
  0x1f   : > { %p2156_p0 = por %p2155_p13, %p2154_p12 }
  0x21   : > { %p2157_p2 = pnand %p2156_p0, %p2150_p11 }
  0x23   : > { %2160 = shalt.err (!%p2157_p2)
}
  0x24   : > { %s2876_s29 = smov 256   ;;  %s2878_s11 = smov 16  }
  0x25   : > { %2062 = dma.hbm_to_vmem [thread:$0]  (!%p2433_p7), %s300_s14, 1024, %s302_s16, %s2446_s17, %s2876_s29, %s2876_s29, %s2878_s11  }
  0x26   : > { %s2460_s12 = sadd.s32 4294967295, %s2331_s26   ;;  %s1946_s13 = sadd.s32 4294967294, %s2331_s26  }
  0x27   : > { %p69_p4 = scmp.ne.s32.totalorder %s2315_s22, %s2311_s21  ;;  %p2881_p5 = scmp.eq.s32.totalorder %s2460_s12, 0 }
  0x28   : > { %p218_p6 = scmp.eq.s32.totalorder %s2460_s12, 1  ;;  %p224_p9 = scmp.eq.s32.totalorder %s1946_s13, 1 }
  0x29   : > { %p1947_p10 = scmp.ge.s32.totalorder %s2331_s26, 1  ;;  %p2470_p11 = por %p2881_p5, %p69_p4 }
  0x2a   : > { %p2477_p12 = por %p218_p6, %p63_p1  ;;  %p2481_p13 = por %p224_p9, %p69_p4 }
  0x2b   : > { %p231_p0 = scmp.lt.s32.totalorder %s2331_s26, 3  ;;  %s2336_s19 = smov [#allocation8]  }
  0x2c   : > { %s2898_s16 = scalar_select %p2481_p13, 1, 0 }
  0x2d   : > { %p2486_p2 = pnand %p1947_p10, %p231_p0  ;;  %s249_s20 = sshll.u32 %s2336_s19, 4  ;;  %s250_s20 = int_to_ptr.vmem [resolvable:$true] %s249_s20 }
  0x2e   : > { %2899 = sst [smem:[#allocation19_spill]] %s2898_s16  ;;  %s267_s30 = scalar_lea.vmem [#allocation2], %s2428_s7 }
  0x2f   : > { %p2052_p3 = pneg %p2486_p2  ;;  %s2902_s0 = sld [smem:[#allocation20_spill]] }
  0x30   : > { %s277_s1 = sshll.u32 %s267_s30, 4  ;;  %s2172_s19 = scalar_lea.vmem %s250_s20, 1536  ;;  %s2503_s1 = int_to_ptr.vmem [resolvable:$true] %s277_s1 }
  0x31   : > { %p2494_p1 = pnand %p2052_p3, %p2881_p5  ;;  %p2173_p6 = scmp.ne.s32.totalorder %s250_s20, %s2172_s19 }
  0x32   : > { %p2180_p0 = scmp.lt.s32.totalorder %s250_s20, %s250_s20  ;;  %p2181_p3 = scmp.lt.s32.totalorder %s2172_s19, %s2172_s19 }
  0x33   : > { %p2163_p4 = pneg %p2494_p1 }
  0x34   : > { %p2182_p5 = por %p2181_p3, %p2180_p0 }
  0x35   : > { %p2175_p9 = pnand %p2173_p6, %p2163_p4 }
  0x37   : > { %p2176_p10 = pneg %p2175_p9 }
  0x39   : > { %p2183_p8 = pnand %p2182_p5, %p2176_p10 }
  0x3b   : > { %2186 = shalt.err (!%p2183_p8)
}
  0x3c   : > { %s2337_s27 = smov 128   ;;  %s2338_s30 = smov 8  }
  0x3d   : > { %2055 = dma.hbm_to_vmem [thread:$0]  (!%p2494_p1), %s2874_s5, 1536, %s250_s20, [#allocation9], %s2337_s27, %s2337_s27, %s2338_s30  }
  0x3e   : > { %s2903_s11 = sand.u32 1, %s2319_s23   ;;  %s2200_s10 = scalar_lea.vmem %s2503_s1, 1024 }
  0x3f   : > { %s264_s25 = scalar_lea.sflag [#allocation3], %s2903_s11  ;;  %p2201_p4 = scmp.ne.s32.totalorder %s2503_s1, %s2200_s10 }
  0x40   : > { %p2904_p5 = pneg %p2433_p7  ;;  %s2339_s19 = smov [#allocation2]  }
  0x41   : > { %s2205_s26 = sshll.u32 %s2339_s19, 4  ;;  %s2206_s26 = int_to_ptr.vmem [resolvable:$false] %s2205_s26 }
  0x42   : > { %p2203_p8 = pnand %p2201_p4, %p2904_p5  ;;  %s2207_s16 = scalar_lea.vmem %s2206_s26, 2048 }
  0x43   : > { %p2208_p9 = scmp.lt.s32.totalorder %s2503_s1, %s2206_s26  ;;  %p2209_p10 = scmp.lt.s32.totalorder %s2207_s16, %s2200_s10 }
  0x44   : > { %p2204_p6 = pneg %p2203_p8 }
  0x45   : > { %p2210_p0 = por %p2209_p10, %p2208_p9 }
  0x47   : > { %p2211_p3 = pnand %p2210_p0, %p2204_p6 }
  0x49   : > { %2214 = shalt.err (!%p2211_p3)
}
  0x4a   : > { %s2905_s27 = smov 16   ;;  %s2906_s20 = smov 256  }
  0x4b   : > { %s2907_s30 = scalar_lea.hbm %s2902_s0, %s2431_s8  ;;  %s324_s16 = scalar_lea.hbm %s2871_s2, %s2431_s8 }
  0x4c   : > { %2059 = dma.hbm_to_vmem [thread:$0]  (!%p2433_p7), %s2907_s30, 1024, %s2503_s1, %s264_s25, %s2906_s20, %s2906_s20, %s2905_s27  }
  0x4d   : > { %s315_s29 = scalar_lea.vmem [#allocation7], %s2428_s7  ;;  %p2908_p4 = pmov %p2904_p5 }
  0x4e   : > { %s325_s13 = sshll.u32 %s315_s29, 4  ;;  %s2340_s11 = smov [#allocation7]   ;;  %s326_s13 = int_to_ptr.vmem [resolvable:$true] %s325_s13 }
  0x4f   : > { %s2228_s19 = scalar_lea.vmem %s326_s13, 1024  ;;  %s2233_s28 = sshll.u32 %s2340_s11, 4  ;;  %s2234_s28 = int_to_ptr.vmem [resolvable:$false] %s2233_s28 }
  0x50   : > { %p2229_p1 = scmp.ne.s32.totalorder %s326_s13, %s2228_s19  ;;  %s2235_s0 = scalar_lea.vmem %s2234_s28, 2048 }
  0x51   : > { %p2236_p6 = scmp.lt.s32.totalorder %s326_s13, %s2234_s28  ;;  %p2237_p9 = scmp.lt.s32.totalorder %s2235_s0, %s2228_s19 }
  0x52   : > { %p2231_p5 = pnand %p2229_p1, %p2908_p4 }
  0x53   : > { %p2238_p10 = por %p2237_p9, %p2236_p6 }
  0x54   : > { %p2232_p8 = pneg %p2231_p5 }
  0x56   : > { %p2239_p0 = pnand %p2238_p10, %p2232_p8 }
  0x58   : > { %2242 = shalt.err (!%p2239_p0)
}
  0x59   : > { %2065 = dma.hbm_to_vmem [thread:$0]  (!%p2433_p7), %s324_s16, 1024, %s326_s13, %s2446_s17, %s2906_s20, %s2906_s20, %s2905_s27  }
  0x5a   : > { %337 = sbr.rel (%p2486_p2) target bundleno = 1856 (0x740), region = 44  ;;  %s2548_s1 = sand.u32 (!%p2486_p2), 1, %s2315_s22  }
  0x5b   : > { %s1960_s0 = sshll.u32 (!%p2486_p2), %s2548_s1, 6  ;;  %s340_s25 = scalar_lea.sflag (!%p2486_p2), [#allocation3], %s2548_s1 }
  0x5c   : > { %s2552_s7 = scalar_lea.vmem (!%p2486_p2), [#allocation2], %s1960_s0 }
  0x5f   : > { %2294 = dma.done.wait (%p2470_p11), %s340_s25, 1024  }
  0x60   : > { %2296 = vsyncadd (%p2470_p11), %s340_s25, 4294966272  ;;  %s348_s8 = sand.u32 1, %s2460_s12   ;;  %s2559_s17 = scalar_lea.vmem [#allocation5], %s1960_s0 }
  0x61   : > { %s349_s9 = scalar_lea.sflag [#allocation6], %s348_s8 }
  0x62   : > { %2298 = dma.done.wait (%p2470_p11), %s349_s9, 2048  }
  0x63   : > { %2300 = vsyncadd (%p2470_p11), %s349_s9, 4294965248  ;;  %s2565_s18 = scalar_lea.vmem [#allocation7], %s1960_s0  ;;  %p2909_p7 = scmp.eq.s32.totalorder %s2460_s12, 0 }
  0x65   : > { %2302 = dma.done.wait (%p2909_p7), [#allocation9], 1536   ;;  %p2910_p2 = pmov %p2909_p7 }
  0x66   : > { %v2341_v0 = vmov 0   ;;  %v2342_v1 = vmov 0.0   ;;  %v427_v2 = vld [vmem:[%s2872_s3] sm:$0xff]  ;;  %v442_v3 = vld [vmem:[%s2873_s4 + $0x18] sm:$0xff]  ;;  %v428_v4 = vld [vmem:[%s2872_s3 + $0x8] sm:$0xff]  ;;  %vm414_vm0 = vcmask 261120  }
  0x67   : > { %2304 = vsyncadd (%p2910_p2), [#allocation9], 4294965760  ;;  %2131 = vset.pattern.permute.xlu1 %v2341_v0  ;;  %572 = vmatprep.mubr.f32.mxu0 %v2342_v1  ;;  %v441_v5 = vld [vmem:[%s2873_s4 + $0x10] sm:$0xff]  ;;  %v438_v6 = vld [vmem:[%s2552_s7 + $0x38] sm:$0xff]  ;;  %s2038_s19 = smul.u32 96, %s2548_s1 }
  0x68   : > { %729 = vmatprep.mubr.f32.mxu1 %v2342_v1  ;;  %463 = vxpose.xlu0.b32.start [1/4] (short) (narrow) %v427_v2, 32  ;;  %v437_v7 = vld [vmem:[%s2552_s7 + $0x30] sm:$0xff]  ;;  %v436_v8 = vld [vmem:[%s2552_s7 + $0x28] sm:$0xff]  ;;  %v435_v9 = vld [vmem:[%s2552_s7 + $0x20] sm:$0xff] }
  0x69   : > { %460 = vperm.xlu1 %2131, %v442_v3   ;;  %532 = vmatprep.subr.mxu0 %v438_v6  ;;  %v429_v10 = vld [vmem:[%s2872_s3 + $0x10] sm:$0xff]  ;;  %v434_v11 = vld [vmem:[%s2552_s7 + $0x18] sm:$0xff]  ;;  %v440_v12 = vld [vmem:[%s2873_s4 + $0x8] sm:$0xff]  ;;  %s2674_s11 = scalar_lea.vmem [#allocation10], %s2038_s19 }
  0x6a   : > { %533 = vmatpush1.msra.mxu0 %v437_v7  ;;  %v433_v13 = vld [vmem:[%s2552_s7 + $0x10] sm:$0xff]  ;;  %v432_v14 = vld [vmem:[%s2552_s7 + $0x8] sm:$0xff]  ;;  %v431_v15 = vld [vmem:[%s2552_s7] sm:$0xff]  ;;  %415 = vst.msk [vmem:[%s2674_s11] sm:$0xff] %vm414_vm0, %v2342_v1  ;;  %s2343_s7 = smov [#allocation10]  }
  0x6b   : > { %534 = vmatprep.subr.mxu0 %v436_v8  ;;  %v430_v16 = vld [vmem:[%s2872_s3 + $0x18] sm:$0xff]  ;;  %v439_v17 = vld [vmem:[%s2873_s4] sm:$0xff]  ;;  %v1977_v19 = vld [vmem:[%s2872_s3 + $0x28] sm:$0xff]  ;;  %416 = vst.msk [vmem:[%s2674_s11 + $0x8] sm:$0xff] %vm414_vm0, %v2342_v1  ;;  %s2247_s27 = sshll.u32 %s2343_s7, 4  ;;  %s2248_s27 = int_to_ptr.vmem [resolvable:$false] %s2247_s27 }
  0x6c   : > { %464 = vxpose.xlu0.b32.cont [2/4] (short) (narrow) %v428_v4, 32  ;;  %535 = vmatpush1.msra.mxu0 %v435_v9  ;;  %v1976_v18 = vld [vmem:[%s2872_s3 + $0x20] sm:$0xff]  ;;  %v1978_v20 = vld [vmem:[%s2872_s3 + $0x30] sm:$0xff]  ;;  %v606_v22 = vld [vmem:[#allocation8 + $0x8] sm:$0xff]  ;;  %417 = vst.msk [vmem:[%s2674_s11 + $0x10] sm:$0xff] %vm414_vm0, %v2342_v1  ;;  %s2249_s20 = scalar_lea.vmem %s2248_s27, 3072 }
  0x6d   : > { %455 = vperm.xlu1 %2131, %v441_v5   ;;  %536 = vmatprep.subr.mxu0 %v434_v11  ;;  %v605_v21 = vld [vmem:[#allocation8] sm:$0xff]  ;;  %v1979_v23 = vld [vmem:[%s2872_s3 + $0x38] sm:$0xff]  ;;  %v607_v24 = vld [vmem:[#allocation8 + $0x10] sm:$0xff]  ;;  %418 = vst.msk [vmem:[%s2674_s11 + $0x18] sm:$0xff] %vm414_vm0, %v2342_v1 }
  0x6e   : > { %537 = vmatpush1.msra.mxu0 %v433_v13  ;;  %v608_v25 = vld [vmem:[#allocation8 + $0x18] sm:$0xff]  ;;  %v1982_v26 = vld [vmem:[%s2873_s4 + $0x30] sm:$0xff]  ;;  %v2004_v30 = vld [vmem:[%s2872_s3 + $0x40] sm:$0xff]  ;;  %419 = vst.msk [vmem:[%s2674_s11 + $0x20] sm:$0xff] %vm414_vm0, %v2342_v1 }
  0x6f   : > { %538 = vmatprep.subr.mxu0 %v432_v14  ;;  %v2005_v32 = vld [vmem:[%s2872_s3 + $0x48] sm:$0xff]  ;;  %v2006_v33 = vld [vmem:[%s2872_s3 + $0x50] sm:$0xff]  ;;  %v2007_v34 = vld [vmem:[%s2872_s3 + $0x58] sm:$0xff]  ;;  %420 = vst.msk [vmem:[%s2674_s11 + $0x28] sm:$0xff] %vm414_vm0, %v2342_v1 }
  0x70   : > { %465 = vxpose.xlu0.b32.cont [3/4] (short) (narrow) %v429_v10, 32  ;;  %539 = vmatpush1.msra.mxu0 %v431_v15  ;;  %v2010_v35 = vld [vmem:[%s2873_s4 + $0x50] sm:$0xff]  ;;  %v2009_v36 = vld [vmem:[%s2873_s4 + $0x48] sm:$0xff]  ;;  %v2008_v37 = vld [vmem:[%s2873_s4 + $0x40] sm:$0xff]  ;;  %421 = vst.msk [vmem:[%s2674_s11 + $0x30] sm:$0xff] %vm414_vm0, %v2342_v1 }
  0x71   : > { %450 = vperm.xlu1 %2131, %v440_v12   ;;  %v1983_v11 = vld [vmem:[%s2873_s4 + $0x38] sm:$0xff]  ;;  %v1981_v12 = vld [vmem:[%s2873_s4 + $0x28] sm:$0xff]  ;;  %v1980_v13 = vld [vmem:[%s2873_s4 + $0x20] sm:$0xff]  ;;  %422 = vst.msk [vmem:[%s2674_s11 + $0x38] sm:$0xff] %vm414_vm0, %v2342_v1 }
  0x72   : > { %v1055_v14 = vld [vmem:[#allocation8 + $0x20] sm:$0xff]  ;;  %v1056_v15 = vld [vmem:[#allocation8 + $0x28] sm:$0xff]  ;;  %423 = vst.msk [vmem:[%s2674_s11 + $0x40] sm:$0xff] %vm414_vm0, %v2342_v1  ;;  %424 = vst.msk [vmem:[%s2674_s11 + $0x48] sm:$0xff] %vm414_vm0, %v2342_v1 }
  0x73   : > { %425 = vst.msk [vmem:[%s2674_s11 + $0x50] sm:$0xff] %vm414_vm0, %v2342_v1  ;;  %426 = vst.msk [vmem:[%s2674_s11 + $0x58] sm:$0xff] %vm414_vm0, %v2342_v1 }
  0x74   : > { %466 = vxpose.xlu0.b32.end [4/4] (short) (narrow) %v430_v16, 32  ;;  %v1057_v16 = vld [vmem:[#allocation8 + $0x30] sm:$0xff] }
  0x75   : > { %445 = vperm.xlu1 %2131, %v439_v17   ;;  %v1058_v17 = vld [vmem:[#allocation8 + $0x38] sm:$0xff] }
  0x78   : > { %609 = vxpose.xlu0.b32.start [1/4] (short) (narrow) %v605_v21, 64 }
  0x7c   : > { %610 = vxpose.xlu0.b32.cont [2/4] (short) (narrow) %v606_v22, 64 }
  0x80   : > { %611 = vxpose.xlu0.b32.cont [3/4] (short) (narrow) %v607_v24, 64 }
  0x84   : > { %612 = vxpose.xlu0.b32.end [4/4] (short) (narrow) %v608_v25, 64 }
  0x9e   : > { %913 = vxpose.xlu1.b32.start [1/4] (short) (narrow) %v1976_v18, 32  ;;  %v2011_v18 = vld [vmem:[%s2873_s4 + $0x58] sm:$0xff] }
  0xa2   : > { %914 = vxpose.xlu1.b32.cont [2/4] (short) (narrow) %v1977_v19, 32 }
  0xa6   : > { %915 = vxpose.xlu1.b32.cont [3/4] (short) (narrow) %v1978_v20, 32 }
  0xaa   : > { %916 = vxpose.xlu1.b32.end [4/4] (short) (narrow) %v1979_v23, 32 }
  0xad   : > { %2132 = vset.pattern.permute.xlu0 %v2341_v0 }
  0xbd   : > { %910 = vperm.xlu0 %2132, %v1983_v11  }
  0xc1   : > { %900 = vperm.xlu0 %2132, %v1981_v12  }
  0xc5   : > { %895 = vperm.xlu0 %2132, %v1980_v13  }
  0xc8   : > { %905 = vperm.xlu1 %2131, %v1982_v26  }
  0xe3   : > { %1059 = vxpose.xlu0.b32.start [1/4] (short) (narrow) %v1055_v14, 64 }
  0xe4   : > { %v479_v27 = vpop.trf.xlu0  ;;  %v461_v38 = vpop.permute.xlu1 %460 }
  0xe5   : > { %1964 = vmatmul.mubr.msk.f32.vlgmr.msra.gmra.mxu0 %vm414_vm0, %v479_v27 }
  0xe6   : > { %578 = vmatprep.mubr.f32.mxu0 %v2342_v1 }
  0xe7   : > { %1060 = vxpose.xlu0.b32.cont [2/4] (short) (narrow) %v1056_v15, 64 }
  0xe8   : > { %v480_v28 = vpop.trf.xlu0  ;;  %v456_v42 = vpop.permute.xlu1 %455 }
  0xe9   : > { %1965 = vmatmul.mubr.msk.f32.gmra.mxu0 %vm414_vm0, %v480_v28 }
  0xea   : > { %584 = vmatprep.mubr.f32.mxu0 %v2342_v1 }
  0xeb   : > { %1061 = vxpose.xlu0.b32.cont [3/4] (short) (narrow) %v1057_v16, 64 }
  0xec   : > { %v481_v29 = vpop.trf.xlu0  ;;  %v451_v47 = vpop.permute.xlu1 %450 }
  0xed   : > { %1966 = vmatmul.mubr.msk.f32.gmra.mxu0 %vm414_vm0, %v481_v29 }
  0xee   : > { %590 = vmatprep.mubr.f32.mxu0 %v2342_v1 }
  0xef   : > { %1062 = vxpose.xlu0.b32.end [4/4] (short) (narrow) %v1058_v17, 64 }
  0xf0   : > { %v482_v31 = vpop.trf.xlu0  ;;  %v446_v57 = vpop.permute.xlu1 %445 }
  0xf1   : > { %1967 = vmatmul.mubr.msk.f32.gmra.mxu0 %vm414_vm0, %v482_v31  ;;  %1364 = vxpose.xlu1.b32.start [1/4] (short) (narrow) %v2004_v30, 32 }
  0xf4   : > { %v625_v46 = vpop.trf.xlu0 }
  0xf5   : > { %1365 = vxpose.xlu1.b32.cont [2/4] (short) (narrow) %v2005_v32, 32 }
  0xf8   : > { %v626_v54 = vpop.trf.xlu0 }
  0xf9   : > { %1366 = vxpose.xlu1.b32.cont [3/4] (short) (narrow) %v2006_v33, 32 }
  0xfc   : > { %v627_v3 = vpop.trf.xlu0 }
  0xfd   : > { %1367 = vxpose.xlu1.b32.end [4/4] (short) (narrow) %v2007_v34, 32 }
 0x100   : > { %v628_v6 = vpop.trf.xlu0 }
 0x104   : > { %v629_v7 = vpop.trf.xlu0 }
 0x108   : > { %v630_v8 = vpop.trf.xlu0 }
 0x10c   : > { %v631_v9 = vpop.trf.xlu0 }
 0x110   : > { %v632_v10 = vpop.trf.xlu0 }
 0x11b   : > { %1356 = vperm.xlu1 %2131, %v2010_v35   ;;  %v887_v35 = vld [vmem:[%s2559_s17 + $0x38] sm:$0xff] }
 0x11f   : > { %1351 = vperm.xlu1 %2131, %v2009_v36   ;;  %v886_v36 = vld [vmem:[%s2559_s17 + $0x30] sm:$0xff] }
 0x123   : > { %1346 = vperm.xlu1 %2131, %v2008_v37   ;;  %v885_v37 = vld [vmem:[%s2559_s17 + $0x28] sm:$0xff] }
 0x128   : > { %1361 = vperm.xlu0 %2132, %v2011_v18  }
 0x1a5   : > { %v574_v39 = vpop.f32.mrf.mxu0 }
 0x1a6   : > { %v575_v62 = vadd.f32 %v574_v39, %v446_v57  ;;  %v883_v39 = vld [vmem:[%s2559_s17 + $0x18] sm:$0xff] }
 0x1a7   : > { %v576_v40 = vpop.f32.mrf.mxu0 }
 0x1a8   : > { %v577_v60 = vadd.f32 %v576_v40, %v446_v57  ;;  %v597_v5 = vmax.f32 %v575_v62, 0.0  ;;  %v882_v40 = vld [vmem:[%s2559_s17 + $0x10] sm:$0xff] }
 0x1a9   : > { %v580_v41 = vpop.f32.mrf.mxu0 }
 0x1aa   : > { %v581_v58 = vadd.f32 %v580_v41, %v451_v47  ;;  %v598_v4 = vmax.f32 %v577_v60, 0.0  ;;  %v881_v41 = vld [vmem:[%s2559_s17 + $0x8] sm:$0xff]  ;;  %v781_v60 = vld [vmem:[%s2674_s11 + $0x18] sm:$0xff] }
 0x1ab   : > { %v582_v43 = vpop.f32.mrf.mxu0 }
 0x1ac   : > { %v583_v55 = vadd.f32 %v582_v43, %v451_v47  ;;  %v599_v2 = vmax.f32 %v581_v58, 0.0  ;;  %v929_v43 = vpop.trf.xlu1  ;;  %v778_v47 = vld [vmem:[%s2674_s11] sm:$0xff]  ;;  %v911_v58 = vpop.permute.xlu0 %910 }
 0x1ad   : > { %v586_v44 = vpop.f32.mrf.mxu0 }
 0x1ae   : > { %v587_v53 = vadd.f32 %v586_v44, %v456_v42  ;;  %v600_v0 = vmax.f32 %v583_v55, 0.0  ;;  %v780_v55 = vld [vmem:[%s2674_s11 + $0x10] sm:$0xff] }
 0x1af   : > { %v588_v45 = vpop.f32.mrf.mxu0 }
 0x1b0   : > { %v589_v51 = vadd.f32 %v588_v45, %v456_v42  ;;  %v601_v63 = vmax.f32 %v587_v53, 0.0  ;;  %v880_v42 = vld [vmem:[%s2559_s17] sm:$0xff]  ;;  %v930_v44 = vpop.trf.xlu1 }
 0x1b1   : > { %v592_v48 = vpop.f32.mrf.mxu0 }
 0x1b2   : > { %v593_v49 = vadd.f32 %v592_v48, %v461_v38  ;;  %v602_v61 = vmax.f32 %v589_v51, 0.0  ;;  %v779_v51 = vld [vmem:[%s2674_s11 + $0x8] sm:$0xff] }
 0x1b3   : > { %v594_v50 = vpop.f32.mrf.mxu0 }
 0x1b4   : > { %v595_v52 = vadd.f32 %v594_v50, %v461_v38  ;;  %v603_v59 = vmax.f32 %v593_v49, 0.0  ;;  %v884_v38 = vld [vmem:[%s2559_s17 + $0x20] sm:$0xff]  ;;  %v931_v45 = vpop.trf.xlu1  ;;  %s2039_s17 = smul.u32 1536, %s2323_s24  ;;  %s1778_s24 = scalar_lea.sflag [#allocation4], %s2548_s1 }
 0x1b6   : > { %v604_v56 = vmax.f32 %v595_v52, 0.0  ;;  %s2817_s9 = scalar_lea.hbm %s2875_s6, %s2039_s17 }
 0x1b8   : > { %689 = vmatprep.subr.mxu1 %v604_v56 }
 0x1b9   : > { %690 = vmatpush1.msra.mxu1 %v603_v59 }
 0x1ba   : > { %691 = vmatprep.subr.mxu1 %v602_v61 }
 0x1bb   : > { %692 = vmatpush1.msra.mxu1 %v601_v63 }
 0x1bc   : > { %693 = vmatprep.subr.mxu1 %v600_v0  ;;  %v901_v0 = vpop.permute.xlu0 %900 }
 0x1bd   : > { %694 = vmatpush1.msra.mxu1 %v599_v2 }
 0x1be   : > { %695 = vmatprep.subr.mxu1 %v598_v4 }
 0x1bf   : > { %696 = vmatpush1.msra.mxu1 %v597_v5 }
 0x1c0   : > { %1968 = vmatmul.mubr.msk.f32.vlgmr.msra.gmra.mxu1 %vm414_vm0, %v625_v46  ;;  %v932_v46 = vpop.trf.xlu1  ;;  %v896_v5 = vpop.permute.xlu0 %895 }
 0x1c1   : > { %735 = vmatprep.mubr.f32.mxu1 %v2342_v1 }
 0x1c4   : > { %1969 = vmatmul.mubr.msk.f32.gmra.mxu1 %vm414_vm0, %v626_v54  ;;  %v906_v11 = vpop.permute.xlu1 %905 }
 0x1c5   : > { %741 = vmatprep.mubr.f32.mxu1 %v2342_v1 }
 0x1c8   : > { %1970 = vmatmul.mubr.msk.f32.gmra.mxu1 %vm414_vm0, %v627_v3 }
 0x1c9   : > { %747 = vmatprep.mubr.f32.mxu1 %v2342_v1 }
 0x1cc   : > { %1971 = vmatmul.mubr.msk.f32.gmra.mxu1 %vm414_vm0, %v628_v6 }
 0x1cd   : > { %753 = vmatprep.mubr.f32.mxu1 %v2342_v1 }
 0x1d0   : > { %1972 = vmatmul.mubr.msk.f32.gmra.mxu1 %vm414_vm0, %v629_v7 }
 0x1d1   : > { %759 = vmatprep.mubr.f32.mxu1 %v2342_v1 }
 0x1d4   : > { %1973 = vmatmul.mubr.msk.f32.gmra.mxu1 %vm414_vm0, %v630_v8 }
 0x1d5   : > { %765 = vmatprep.mubr.f32.mxu1 %v2342_v1 }
 0x1d8   : > { %1974 = vmatmul.mubr.msk.f32.gmra.mxu1 %vm414_vm0, %v631_v9  ;;  %v1075_v9 = vpop.trf.xlu0 }
 0x1d9   : > { %771 = vmatprep.mubr.f32.mxu1 %v2342_v1 }
 0x1dc   : > { %1975 = vmatmul.mubr.msk.f32.gmra.mxu1 %vm414_vm0, %v632_v10 }
 0x1dd   : > { %1179 = vmatprep.mubr.f32.mxu1 %v2342_v1 }
 0x280   : > { %v731_v19 = vpop.f32.mrf.mxu1 }
 0x282   : > { %v733_v20 = vpop.f32.mrf.mxu1 }
 0x283   : > { %846 = vmatprep.mubr.f32.mxu0 %v733_v20 }
 0x284   : > { %v737_v21 = vpop.f32.mrf.mxu1 }
 0x286   : > { %v739_v22 = vpop.f32.mrf.mxu1 }
 0x288   : > { %v743_v23 = vpop.f32.mrf.mxu1 }
 0x28a   : > { %v745_v24 = vpop.f32.mrf.mxu1 }
 0x28c   : > { %v749_v25 = vpop.f32.mrf.mxu1 }
 0x28e   : > { %v751_v26 = vpop.f32.mrf.mxu1 }
 0x290   : > { %v755_v27 = vpop.f32.mrf.mxu1 }
 0x292   : > { %v757_v28 = vpop.f32.mrf.mxu1 }
 0x294   : > { %v761_v29 = vpop.f32.mrf.mxu1 }
 0x296   : > { %v763_v30 = vpop.f32.mrf.mxu1 }
 0x298   : > { %v767_v31 = vpop.f32.mrf.mxu1 }
 0x29a   : > { %v769_v32 = vpop.f32.mrf.mxu1 }
 0x29c   : > { %v773_v33 = vpop.f32.mrf.mxu1 }
 0x29e   : > { %v775_v34 = vpop.f32.mrf.mxu1 }
 0x29f   : > { %806 = vmatprep.subr.mxu0 %v775_v34 }
 0x2a0   : > { %807 = vmatpush1.xpose.msra.mxu0 %v773_v33 }
 0x2a1   : > { %808 = vmatprep.subr.mxu0 %v769_v32 }
 0x2a4   : > { %809 = vmatpush1.xpose.msra.mxu0 %v767_v31 }
 0x2a5   : > { %810 = vmatprep.subr.mxu0 %v763_v30 }
 0x2a8   : > { %811 = vmatpush1.xpose.msra.mxu0 %v761_v29 }
 0x2a9   : > { %812 = vmatprep.subr.mxu0 %v757_v28 }
 0x2ac   : > { %813 = vmatpush1.xpose.msra.mxu0 %v755_v27 }
 0x2ad   : > { %981 = vmatprep.subr.mxu0 %v887_v35 }
 0x2af   : > { %847 = vmatmul.mubr.f32.vlgmr.msra.gmra.mxu0 %v731_v19  ;;  %v1076_v19 = vpop.trf.xlu0 }
 0x2b0   : > { %851 = vmatprep.mubr.f32.mxu0 %v739_v22  ;;  %982 = vmatpush1.msra.mxu0 %v886_v36  ;;  %v1506_v36 = vld [vmem:[#allocation8 + $0x40] sm:$0xff] }
 0x2b1   : > { %983 = vmatprep.subr.mxu0 %v885_v37  ;;  %1510 = vxpose.xlu1.b32.start [1/4] (short) (narrow) %v1506_v36, 64  ;;  %v1507_v37 = vld [vmem:[#allocation8 + $0x48] sm:$0xff] }
 0x2b2   : > { %984 = vmatpush1.msra.mxu0 %v884_v38  ;;  %v1508_v38 = vld [vmem:[#allocation8 + $0x50] sm:$0xff] }
 0x2b3   : > { %852 = vmatmul.mubr.f32.gmra.mxu0 %v737_v21  ;;  %985 = vmatprep.subr.mxu0 %v883_v39  ;;  %v1077_v29 = vpop.trf.xlu0  ;;  %v1509_v39 = vld [vmem:[#allocation8 + $0x58] sm:$0xff] }
 0x2b4   : > { %856 = vmatprep.mubr.f32.mxu0 %v745_v24  ;;  %986 = vmatpush1.msra.mxu0 %v882_v40 }
 0x2b5   : > { %987 = vmatprep.subr.mxu0 %v881_v41  ;;  %1511 = vxpose.xlu1.b32.cont [2/4] (short) (narrow) %v1507_v37, 64 }
 0x2b6   : > { %988 = vmatpush1.msra.mxu0 %v880_v42 }
 0x2b7   : > { %857 = vmatmul.mubr.f32.gmra.mxu0 %v743_v23  ;;  %v1078_v31 = vpop.trf.xlu0 }
 0x2b8   : > { %861 = vmatprep.mubr.f32.mxu0 %v751_v26 }
 0x2b9   : > { %1512 = vxpose.xlu1.b32.cont [3/4] (short) (narrow) %v1508_v38, 64 }
 0x2bb   : > { %862 = vmatmul.mubr.f32.gmra.mxu0 %v749_v25  ;;  %v1079_v32 = vpop.trf.xlu0 }
 0x2bc   : > { %1021 = vmatprep.mubr.f32.mxu0 %v2342_v1 }
 0x2bd   : > { %1513 = vxpose.xlu1.b32.end [4/4] (short) (narrow) %v1509_v39, 64 }
 0x2bf   : > { %1984 = vmatmul.mubr.msk.f32.vlgmr.msra.gmra.mxu0 %vm414_vm0, %v929_v43  ;;  %v1080_v33 = vpop.trf.xlu0 }
 0x2c0   : > { %1027 = vmatprep.mubr.f32.mxu0 %v2342_v1 }
 0x2c3   : > { %1985 = vmatmul.mubr.msk.f32.gmra.mxu0 %vm414_vm0, %v930_v44  ;;  %v1081_v34 = vpop.trf.xlu0 }
 0x2c4   : > { %1033 = vmatprep.mubr.f32.mxu0 %v2342_v1 }
 0x2c7   : > { %1986 = vmatmul.mubr.msk.f32.gmra.mxu0 %vm414_vm0, %v931_v45  ;;  %v1082_v35 = vpop.trf.xlu0 }
 0x2c8   : > { %1039 = vmatprep.mubr.f32.mxu0 %v2342_v1 }
 0x2cb   : > { %1987 = vmatmul.mubr.msk.f32.gmra.mxu0 %vm414_vm0, %v932_v46 }
 0x36f   : > { %v848_v48 = vpop.f32.mrf.mxu0 }
 0x370   : > { %v867_v49 = vadd.f32 %v848_v48, %v778_v47 }
 0x371   : > { %v850_v50 = vpop.f32.mrf.mxu0 }
 0x372   : > { %871 = vst.msk [vmem:[%s2674_s11] sm:$0xff] %vm414_vm0, %v867_v49 }
 0x373   : > { %v853_v52 = vpop.f32.mrf.mxu0 }
 0x374   : > { %v868_v53 = vadd.f32 %v853_v52, %v779_v51 }
 0x375   : > { %v855_v54 = vpop.f32.mrf.mxu0 }
 0x376   : > { %872 = vst.msk [vmem:[%s2674_s11 + $0x8] sm:$0xff] %vm414_vm0, %v868_v53 }
 0x377   : > { %v858_v56 = vpop.f32.mrf.mxu0 }
 0x378   : > { %v869_v57 = vadd.f32 %v858_v56, %v780_v55  ;;  %v1338_v56 = vld [vmem:[%s2565_s18 + $0x38] sm:$0xff] }
 0x379   : > { %v860_v59 = vpop.f32.mrf.mxu0 }
 0x37a   : > { %873 = vst.msk [vmem:[%s2674_s11 + $0x10] sm:$0xff] %vm414_vm0, %v869_v57  ;;  %v1337_v57 = vld [vmem:[%s2565_s18 + $0x30] sm:$0xff]  ;;  %v1335_v59 = vld [vmem:[%s2565_s18 + $0x20] sm:$0xff] }
 0x37b   : > { %v863_v61 = vpop.f32.mrf.mxu0 }
 0x37c   : > { %v870_v62 = vadd.f32 %v863_v61, %v781_v60  ;;  %v1334_v60 = vld [vmem:[%s2565_s18 + $0x18] sm:$0xff]  ;;  %v1333_v61 = vld [vmem:[%s2565_s18 + $0x10] sm:$0xff] }
 0x37d   : > { %v865_v63 = vpop.f32.mrf.mxu0 }
 0x37e   : > { %874 = vst.msk [vmem:[%s2674_s11 + $0x18] sm:$0xff] %vm414_vm0, %v870_v62  ;;  %v1332_v62 = vld [vmem:[%s2565_s18 + $0x8] sm:$0xff]  ;;  %v1331_v63 = vld [vmem:[%s2565_s18] sm:$0xff] }
 0x37f   : > { %v1023_v2 = vpop.f32.mrf.mxu0 }
 0x380   : > { %v1024_v24 = vadd.f32 %v1023_v2, %v896_v5 }
 0x381   : > { %v1025_v3 = vpop.f32.mrf.mxu0 }
 0x382   : > { %v1026_v22 = vadd.f32 %v1025_v3, %v896_v5  ;;  %v1046_v30 = vmax.f32 %v1024_v24, 0.0  ;;  %v1996_v5 = vld [vmem:[%s2674_s11 + $0x20] sm:$0xff] }
 0x383   : > { %v1029_v4 = vpop.f32.mrf.mxu0 }
 0x384   : > { %v1030_v20 = vadd.f32 %v1029_v4, %v901_v0  ;;  %v1047_v28 = vmax.f32 %v1026_v22, 0.0 }
 0x385   : > { %v1031_v6 = vpop.f32.mrf.mxu0 }
 0x386   : > { %v1032_v17 = vadd.f32 %v1031_v6, %v901_v0  ;;  %v1048_v27 = vmax.f32 %v1030_v20, 0.0  ;;  %v1380_v0 = vpop.trf.xlu1 }
 0x387   : > { %v1035_v7 = vpop.f32.mrf.mxu0 }
 0x388   : > { %v1036_v16 = vadd.f32 %v1035_v7, %v906_v11  ;;  %v1049_v26 = vmax.f32 %v1032_v17, 0.0 }
 0x389   : > { %v1037_v8 = vpop.f32.mrf.mxu0 }
 0x38a   : > { %v1038_v14 = vadd.f32 %v1037_v8, %v906_v11  ;;  %v1050_v25 = vmax.f32 %v1036_v16, 0.0  ;;  %v1381_v2 = vpop.trf.xlu1 }
 0x38b   : > { %v1041_v10 = vpop.f32.mrf.mxu0 }
 0x38c   : > { %v1042_v12 = vadd.f32 %v1041_v10, %v911_v58  ;;  %v1051_v23 = vmax.f32 %v1038_v14, 0.0 }
 0x38d   : > { %v1043_v13 = vpop.f32.mrf.mxu0 }
 0x38e   : > { %v1044_v15 = vadd.f32 %v1043_v13, %v911_v58  ;;  %v1052_v21 = vmax.f32 %v1042_v12, 0.0  ;;  %v1336_v58 = vld [vmem:[%s2565_s18 + $0x28] sm:$0xff]  ;;  %v1382_v3 = vpop.trf.xlu1  ;;  %v1998_v13 = vld [vmem:[%s2674_s11 + $0x30] sm:$0xff]  ;;  %s1793_s18 = sshll.u32 %s2674_s11, 4  ;;  %s2819_s18 = int_to_ptr.vmem [resolvable:$true] %s1793_s18 }
 0x38f   : > { %s2243_s15 = scalar_lea.vmem %s2819_s18, 1536  ;;  %p2250_p4 = scmp.lt.s32.totalorder %s2819_s18, %s2248_s27 }
 0x390   : > { %v1053_v18 = vmax.f32 %v1044_v15, 0.0  ;;  %p2244_p11 = scmp.ne.s32.totalorder %s2819_s18, %s2243_s15  ;;  %p2251_p5 = scmp.lt.s32.totalorder %s2249_s20, %s2243_s15 }
 0x392   : > { %1139 = vmatprep.subr.mxu1 %v1053_v18  ;;  %v1383_v4 = vpop.trf.xlu1  ;;  %v1999_v18 = vld [vmem:[%s2674_s11 + $0x38] sm:$0xff]  ;;  %p2245_p3 = pnand %p2244_p11, %p2477_p12  ;;  %p2252_p8 = por %p2251_p5, %p2250_p4 }
 0x393   : > { %1140 = vmatpush1.msra.mxu1 %v1052_v21 }
 0x394   : > { %1141 = vmatprep.subr.mxu1 %v1051_v23  ;;  %p2246_p1 = pneg %p2245_p3 }
 0x395   : > { %1142 = vmatpush1.msra.mxu1 %v1050_v25 }
 0x396   : > { %1143 = vmatprep.subr.mxu1 %v1049_v26  ;;  %v1357_v16 = vpop.permute.xlu1 %1356  ;;  %p2253_p6 = pnand %p2252_p8, %p2246_p1 }
 0x397   : > { %1144 = vmatpush1.msra.mxu1 %v1048_v27 }
 0x398   : > { %1145 = vmatprep.subr.mxu1 %v1047_v28 }
 0x399   : > { %1146 = vmatpush1.msra.mxu1 %v1046_v30 }
 0x39a   : > { %1988 = vmatmul.mubr.msk.f32.vlgmr.msra.gmra.mxu1 %vm414_vm0, %v1075_v9  ;;  %v1997_v9 = vld [vmem:[%s2674_s11 + $0x28] sm:$0xff]  ;;  %v1352_v22 = vpop.permute.xlu1 %1351 }
 0x39b   : > { %1185 = vmatprep.mubr.f32.mxu1 %v2342_v1 }
 0x39e   : > { %1989 = vmatmul.mubr.msk.f32.gmra.mxu1 %vm414_vm0, %v1076_v19  ;;  %v1347_v26 = vpop.permute.xlu1 %1346 }
 0x39f   : > { %1191 = vmatprep.mubr.f32.mxu1 %v2342_v1 }
 0x3a2   : > { %1990 = vmatmul.mubr.msk.f32.gmra.mxu1 %vm414_vm0, %v1077_v29  ;;  %v1526_v30 = vpop.trf.xlu1 }
 0x3a3   : > { %1197 = vmatprep.mubr.f32.mxu1 %v2342_v1 }
 0x3a6   : > { %1991 = vmatmul.mubr.msk.f32.gmra.mxu1 %vm414_vm0, %v1078_v31  ;;  %v1527_v38 = vpop.trf.xlu1 }
 0x3a7   : > { %1203 = vmatprep.mubr.f32.mxu1 %v2342_v1 }
 0x3aa   : > { %1992 = vmatmul.mubr.msk.f32.gmra.mxu1 %vm414_vm0, %v1079_v32  ;;  %v1362_v32 = vpop.permute.xlu0 %1361 }
 0x3ab   : > { %1209 = vmatprep.mubr.f32.mxu1 %v2342_v1 }
 0x3ae   : > { %1993 = vmatmul.mubr.msk.f32.gmra.mxu1 %vm414_vm0, %v1080_v33 }
 0x3af   : > { %1215 = vmatprep.mubr.f32.mxu1 %v2342_v1 }
 0x3b2   : > { %1994 = vmatmul.mubr.msk.f32.gmra.mxu1 %vm414_vm0, %v1081_v34 }
 0x3b3   : > { %1221 = vmatprep.mubr.f32.mxu1 %v2342_v1 }
 0x3b6   : > { %1995 = vmatmul.mubr.msk.f32.gmra.mxu1 %vm414_vm0, %v1082_v35 }
 0x3b7   : > { %1630 = vmatprep.mubr.f32.mxu1 %v2342_v1 }
 0x45a   : > { %v1181_v40 = vpop.f32.mrf.mxu1 }
 0x45c   : > { %v1183_v41 = vpop.f32.mrf.mxu1 }
 0x45d   : > { %1297 = vmatprep.mubr.f32.mxu0 %v1183_v41 }
 0x45e   : > { %v1187_v42 = vpop.f32.mrf.mxu1 }
 0x460   : > { %v1189_v43 = vpop.f32.mrf.mxu1 }
 0x462   : > { %v1193_v44 = vpop.f32.mrf.mxu1 }
 0x464   : > { %v1195_v45 = vpop.f32.mrf.mxu1 }
 0x466   : > { %v1199_v46 = vpop.f32.mrf.mxu1 }
 0x468   : > { %v1201_v47 = vpop.f32.mrf.mxu1 }
 0x46a   : > { %v1205_v48 = vpop.f32.mrf.mxu1 }
 0x46c   : > { %v1207_v49 = vpop.f32.mrf.mxu1 }
 0x46e   : > { %v1211_v50 = vpop.f32.mrf.mxu1 }
 0x470   : > { %v1213_v51 = vpop.f32.mrf.mxu1 }
 0x472   : > { %v1217_v52 = vpop.f32.mrf.mxu1 }
 0x474   : > { %v1219_v53 = vpop.f32.mrf.mxu1 }
 0x476   : > { %v1223_v54 = vpop.f32.mrf.mxu1 }
 0x478   : > { %v1225_v55 = vpop.f32.mrf.mxu1 }
 0x479   : > { %1257 = vmatprep.subr.mxu0 %v1225_v55 }
 0x47a   : > { %1258 = vmatpush1.xpose.msra.mxu0 %v1223_v54 }
 0x47b   : > { %1259 = vmatprep.subr.mxu0 %v1219_v53 }
 0x47e   : > { %1260 = vmatpush1.xpose.msra.mxu0 %v1217_v52 }
 0x47f   : > { %1261 = vmatprep.subr.mxu0 %v1213_v51 }
 0x482   : > { %1262 = vmatpush1.xpose.msra.mxu0 %v1211_v50 }
 0x483   : > { %1263 = vmatprep.subr.mxu0 %v1207_v49  ;;  %v1528_v49 = vpop.trf.xlu1 }
 0x486   : > { %1264 = vmatpush1.xpose.msra.mxu0 %v1205_v48 }
 0x487   : > { %1432 = vmatprep.subr.mxu0 %v1338_v56  ;;  %v1529_v52 = vpop.trf.xlu1 }
 0x489   : > { %1298 = vmatmul.mubr.f32.vlgmr.msra.gmra.mxu0 %v1181_v40 }
 0x48a   : > { %1302 = vmatprep.mubr.f32.mxu0 %v1189_v43  ;;  %1433 = vmatpush1.msra.mxu0 %v1337_v57 }
 0x48b   : > { %1434 = vmatprep.subr.mxu0 %v1336_v58  ;;  %v1530_v53 = vpop.trf.xlu1 }
 0x48c   : > { %1435 = vmatpush1.msra.mxu0 %v1335_v59 }
 0x48d   : > { %1303 = vmatmul.mubr.f32.gmra.mxu0 %v1187_v42  ;;  %1436 = vmatprep.subr.mxu0 %v1334_v60 }
 0x48e   : > { %1307 = vmatprep.mubr.f32.mxu0 %v1195_v45  ;;  %1437 = vmatpush1.msra.mxu0 %v1333_v61 }
 0x48f   : > { %1438 = vmatprep.subr.mxu0 %v1332_v62  ;;  %v1531_v54 = vpop.trf.xlu1 }
 0x490   : > { %1439 = vmatpush1.msra.mxu0 %v1331_v63 }
 0x491   : > { %1308 = vmatmul.mubr.f32.gmra.mxu0 %v1193_v44 }
 0x492   : > { %1312 = vmatprep.mubr.f32.mxu0 %v1201_v47 }
 0x493   : > { %v1532_v55 = vpop.trf.xlu1 }
 0x495   : > { %1313 = vmatmul.mubr.f32.gmra.mxu0 %v1199_v46 }
 0x496   : > { %1472 = vmatprep.mubr.f32.mxu0 %v2342_v1 }
 0x497   : > { %v1533_v56 = vpop.trf.xlu1 }
 0x499   : > { %2012 = vmatmul.mubr.msk.f32.vlgmr.msra.gmra.mxu0 %vm414_vm0, %v1380_v0 }
 0x49a   : > { %1478 = vmatprep.mubr.f32.mxu0 %v2342_v1 }
 0x49d   : > { %2013 = vmatmul.mubr.msk.f32.gmra.mxu0 %vm414_vm0, %v1381_v2 }
 0x49e   : > { %1484 = vmatprep.mubr.f32.mxu0 %v2342_v1 }
 0x4a1   : > { %2014 = vmatmul.mubr.msk.f32.gmra.mxu0 %vm414_vm0, %v1382_v3 }
 0x4a2   : > { %1490 = vmatprep.mubr.f32.mxu0 %v2342_v1 }
 0x4a5   : > { %2015 = vmatmul.mubr.msk.f32.gmra.mxu0 %vm414_vm0, %v1383_v4 }
 0x549   : > { %v1299_v6 = vpop.f32.mrf.mxu0 }
 0x54a   : > { %v1318_v7 = vadd.f32 %v1996_v5, %v1299_v6 }
 0x54b   : > { %v1301_v8 = vpop.f32.mrf.mxu0 }
 0x54c   : > { %2000 = vst.msk [vmem:[%s2674_s11 + $0x20] sm:$0xff] %vm414_vm0, %v1318_v7 }
 0x54d   : > { %v1304_v10 = vpop.f32.mrf.mxu0 }
 0x54e   : > { %v1319_v11 = vadd.f32 %v1997_v9, %v1304_v10 }
 0x54f   : > { %v1306_v12 = vpop.f32.mrf.mxu0 }
 0x550   : > { %2001 = vst.msk [vmem:[%s2674_s11 + $0x28] sm:$0xff] %vm414_vm0, %v1319_v11 }
 0x551   : > { %v1309_v14 = vpop.f32.mrf.mxu0 }
 0x552   : > { %v1320_v15 = vadd.f32 %v1998_v13, %v1309_v14  ;;  %v2025_v13 = vld [vmem:[%s2674_s11 + $0x48] sm:$0xff] }
 0x553   : > { %v1311_v17 = vpop.f32.mrf.mxu0 }
 0x554   : > { %2002 = vst.msk [vmem:[%s2674_s11 + $0x30] sm:$0xff] %vm414_vm0, %v1320_v15  ;;  %v2026_v17 = vld [vmem:[%s2674_s11 + $0x50] sm:$0xff] }
 0x555   : > { %v1314_v19 = vpop.f32.mrf.mxu0 }
 0x556   : > { %v1321_v20 = vadd.f32 %v1999_v18, %v1314_v19 }
 0x557   : > { %v1316_v21 = vpop.f32.mrf.mxu0 }
 0x558   : > { %2003 = vst.msk [vmem:[%s2674_s11 + $0x38] sm:$0xff] %vm414_vm0, %v1321_v20  ;;  %v2027_v21 = vld [vmem:[%s2674_s11 + $0x58] sm:$0xff] }
 0x559   : > { %v1474_v23 = vpop.f32.mrf.mxu0 }
 0x55a   : > { %v1475_v45 = vadd.f32 %v1474_v23, %v1347_v26 }
 0x55b   : > { %v1476_v24 = vpop.f32.mrf.mxu0 }
 0x55c   : > { %v1477_v43 = vadd.f32 %v1476_v24, %v1347_v26  ;;  %v1497_v51 = vmax.f32 %v1475_v45, 0.0 }
 0x55d   : > { %v1480_v25 = vpop.f32.mrf.mxu0 }
 0x55e   : > { %v1481_v41 = vadd.f32 %v1480_v25, %v1352_v22  ;;  %v1498_v50 = vmax.f32 %v1477_v43, 0.0 }
 0x55f   : > { %v1482_v27 = vpop.f32.mrf.mxu0 }
 0x560   : > { %v1483_v39 = vadd.f32 %v1482_v27, %v1352_v22  ;;  %v1499_v48 = vmax.f32 %v1481_v41, 0.0 }
 0x561   : > { %v1486_v28 = vpop.f32.mrf.mxu0 }
 0x562   : > { %v1487_v37 = vadd.f32 %v1486_v28, %v1357_v16  ;;  %v1500_v47 = vmax.f32 %v1483_v39, 0.0 }
 0x563   : > { %v1488_v29 = vpop.f32.mrf.mxu0 }
 0x564   : > { %v1489_v35 = vadd.f32 %v1488_v29, %v1357_v16  ;;  %v1501_v46 = vmax.f32 %v1487_v37, 0.0 }
 0x565   : > { %v1492_v31 = vpop.f32.mrf.mxu0 }
 0x566   : > { %v1493_v33 = vadd.f32 %v1492_v31, %v1362_v32  ;;  %v1502_v44 = vmax.f32 %v1489_v35, 0.0 }
 0x567   : > { %v1494_v34 = vpop.f32.mrf.mxu0 }
 0x568   : > { %v1495_v36 = vadd.f32 %v1494_v34, %v1362_v32  ;;  %v1503_v42 = vmax.f32 %v1493_v33, 0.0 }
 0x56a   : > { %v1504_v40 = vmax.f32 %v1495_v36, 0.0 }
 0x56c   : > { %1590 = vmatprep.subr.mxu1 %v1504_v40 }
 0x56d   : > { %1591 = vmatpush1.msra.mxu1 %v1503_v42 }
 0x56e   : > { %1592 = vmatprep.subr.mxu1 %v1502_v44 }
 0x56f   : > { %1593 = vmatpush1.msra.mxu1 %v1501_v46 }
 0x570   : > { %1594 = vmatprep.subr.mxu1 %v1500_v47 }
 0x571   : > { %1595 = vmatpush1.msra.mxu1 %v1499_v48 }
 0x572   : > { %1596 = vmatprep.subr.mxu1 %v1498_v50 }
 0x573   : > { %1597 = vmatpush1.msra.mxu1 %v1497_v51 }
 0x574   : > { %2016 = vmatmul.mubr.msk.f32.vlgmr.msra.gmra.mxu1 %vm414_vm0, %v1526_v30 }
 0x575   : > { %1636 = vmatprep.mubr.f32.mxu1 %v2342_v1 }
 0x578   : > { %2017 = vmatmul.mubr.msk.f32.gmra.mxu1 %vm414_vm0, %v1527_v38 }
 0x579   : > { %1642 = vmatprep.mubr.f32.mxu1 %v2342_v1 }
 0x57c   : > { %2018 = vmatmul.mubr.msk.f32.gmra.mxu1 %vm414_vm0, %v1528_v49 }
 0x57d   : > { %1648 = vmatprep.mubr.f32.mxu1 %v2342_v1 }
 0x580   : > { %2019 = vmatmul.mubr.msk.f32.gmra.mxu1 %vm414_vm0, %v1529_v52 }
 0x581   : > { %1654 = vmatprep.mubr.f32.mxu1 %v2342_v1 }
 0x584   : > { %2020 = vmatmul.mubr.msk.f32.gmra.mxu1 %vm414_vm0, %v1530_v53 }
 0x585   : > { %1660 = vmatprep.mubr.f32.mxu1 %v2342_v1 }
 0x588   : > { %2021 = vmatmul.mubr.msk.f32.gmra.mxu1 %vm414_vm0, %v1531_v54 }
 0x589   : > { %1666 = vmatprep.mubr.f32.mxu1 %v2342_v1 }
 0x58c   : > { %2022 = vmatmul.mubr.msk.f32.gmra.mxu1 %vm414_vm0, %v1532_v55 }
 0x58d   : > { %1672 = vmatprep.mubr.f32.mxu1 %v2342_v1  ;;  %v2024_v1 = vld [vmem:[%s2674_s11 + $0x40] sm:$0xff] }
 0x590   : > { %2023 = vmatmul.mubr.msk.f32.gmra.mxu1 %vm414_vm0, %v1533_v56 }
 0x634   : > { %v1632_v57 = vpop.f32.mrf.mxu1 }
 0x636   : > { %v1634_v58 = vpop.f32.mrf.mxu1 }
 0x637   : > { %1748 = vmatprep.mubr.f32.mxu0 %v1634_v58 }
 0x638   : > { %v1638_v59 = vpop.f32.mrf.mxu1 }
 0x63a   : > { %v1640_v60 = vpop.f32.mrf.mxu1 }
 0x63c   : > { %v1644_v61 = vpop.f32.mrf.mxu1 }
 0x63e   : > { %v1646_v62 = vpop.f32.mrf.mxu1 }
 0x640   : > { %v1650_v63 = vpop.f32.mrf.mxu1 }
 0x642   : > { %v1652_v0 = vpop.f32.mrf.mxu1 }
 0x644   : > { %v1656_v2 = vpop.f32.mrf.mxu1 }
 0x646   : > { %v1658_v3 = vpop.f32.mrf.mxu1 }
 0x648   : > { %v1662_v4 = vpop.f32.mrf.mxu1 }
 0x64a   : > { %v1664_v5 = vpop.f32.mrf.mxu1 }
 0x64c   : > { %v1668_v6 = vpop.f32.mrf.mxu1 }
 0x64e   : > { %v1670_v7 = vpop.f32.mrf.mxu1 }
 0x650   : > { %v1674_v8 = vpop.f32.mrf.mxu1 }
 0x652   : > { %v1676_v9 = vpop.f32.mrf.mxu1 }
 0x653   : > { %1708 = vmatprep.subr.mxu0 %v1676_v9 }
 0x654   : > { %1709 = vmatpush1.xpose.msra.mxu0 %v1674_v8 }
 0x655   : > { %1710 = vmatprep.subr.mxu0 %v1670_v7 }
 0x658   : > { %1711 = vmatpush1.xpose.msra.mxu0 %v1668_v6 }
 0x659   : > { %1712 = vmatprep.subr.mxu0 %v1664_v5 }
 0x65c   : > { %1713 = vmatpush1.xpose.msra.mxu0 %v1662_v4 }
 0x65d   : > { %1714 = vmatprep.subr.mxu0 %v1658_v3 }
 0x660   : > { %1715 = vmatpush1.xpose.msra.mxu0 %v1656_v2 }
 0x663   : > { %1749 = vmatmul.mubr.f32.vlgmr.msra.gmra.mxu0 %v1632_v57 }
 0x664   : > { %1753 = vmatprep.mubr.f32.mxu0 %v1640_v60 }
 0x667   : > { %1754 = vmatmul.mubr.f32.gmra.mxu0 %v1638_v59 }
 0x668   : > { %1758 = vmatprep.mubr.f32.mxu0 %v1646_v62 }
 0x66b   : > { %1759 = vmatmul.mubr.f32.gmra.mxu0 %v1644_v61 }
 0x66c   : > { %1763 = vmatprep.mubr.f32.mxu0 %v1652_v0 }
 0x66f   : > { %1764 = vmatmul.mubr.f32.gmra.mxu0 %v1650_v63 }
 0x723   : > { %v1750_v10 = vpop.f32.mrf.mxu0 }
 0x724   : > { %v1769_v11 = vadd.f32 %v2024_v1, %v1750_v10 }
 0x725   : > { %v1752_v12 = vpop.f32.mrf.mxu0 }
 0x726   : > { %2028 = vst.msk [vmem:[%s2674_s11 + $0x40] sm:$0xff] %vm414_vm0, %v1769_v11 }
 0x727   : > { %v1755_v14 = vpop.f32.mrf.mxu0 }
 0x728   : > { %v1770_v15 = vadd.f32 %v2025_v13, %v1755_v14 }
 0x729   : > { %v1757_v16 = vpop.f32.mrf.mxu0 }
 0x72a   : > { %2029 = vst.msk [vmem:[%s2674_s11 + $0x48] sm:$0xff] %vm414_vm0, %v1770_v15 }
 0x72b   : > { %v1760_v18 = vpop.f32.mrf.mxu0 }
 0x72c   : > { %v1771_v19 = vadd.f32 %v2026_v17, %v1760_v18 }
 0x72d   : > { %v1762_v20 = vpop.f32.mrf.mxu0 }
 0x72e   : > { %2030 = vst.msk [vmem:[%s2674_s11 + $0x50] sm:$0xff] %vm414_vm0, %v1771_v19 }
 0x72f   : > { %v1765_v22 = vpop.f32.mrf.mxu0 }
 0x730   : > { %v1772_v23 = vadd.f32 %v2027_v21, %v1765_v22 }
 0x731   : > { %v1767_v24 = vpop.f32.mrf.mxu0 }
 0x732   : > { %2031 = vst.msk [vmem:[%s2674_s11 + $0x58] sm:$0xff] %vm414_vm0, %v1772_v23 }
 0x733   : > { %2256 = shalt.err (!%p2253_p6)
}
 0x734   : > { %s2257_s12 = scalar_lea.hbm %s2817_s9, 1536  ;;  %s2261_s10 = scalar_lea.hbm %s2875_s6, 3072 }
 0x735   : > { %p2258_p9 = scmp.ne.s32.totalorder %s2817_s9, %s2257_s12  ;;  %p2262_p7 = scmp.lt.s32.totalorder %s2817_s9, %s2875_s6 }
 0x736   : > { %p2263_p2 = scmp.lt.s32.totalorder %s2261_s10, %s2257_s12 }
 0x737   : > { %p2259_p10 = pnand %p2258_p9, %p2477_p12 }
 0x738   : > { %p2264_p11 = por %p2263_p2, %p2262_p7 }
 0x739   : > { %p2260_p0 = pneg %p2259_p10 }
 0x73b   : > { %p2265_p3 = pnand %p2264_p11, %p2260_p0 }
 0x73d   : > { %2268 = shalt.err (!%p2265_p3)
}
 0x73e   : > { %s2344_s13 = smov 128   ;;  %s2345_s19 = smov 8  }
 0x73f   : > { %2050 = dma.vmem_to_hbm [thread:$0]  (%p2477_p12), %s2819_s18, 1536, %s2817_s9, %s1778_s24, %s2344_s13, %s2344_s13, %s2345_s19  }
 0x740 PF: > { %s2912_s28 = sld [smem:[#allocation16_spill]]  ;;  %s1808_s0 = sand.u32 1, %s2311_s21  }
 0x741   : > { %s1809_s17 = scalar_lea.sflag [#allocation4], %s1808_s0 }
 0x746   : > { %p2913_p1 = scmp.ge.s32.totalorder %s2912_s28, 2 }
 0x748   : > { %p2067_p4 = pnand %p2913_p1, %p2481_p13 }
 0x74a   : > { %p2068_p5 = pneg %p2067_p4 }
 0x74c   : > { %2306 = dma.done.wait (%p2068_p5), %s1809_s17, 1536  }
 0x74d   : > { %2308 = vsyncadd (%p2068_p5), %s1809_s17, 4294965760  ;;  %s26_s26 = sadd.s32 1, %s2912_s28   ;;  %s2914_s14 = sld [smem:[#allocation18_spill]] }
 0x74e   : > { %p23_p8 = scmp.ge.s32.totalorder %s26_s26, 4   ;;  %s2915_s24 = sld [smem:[#allocation15_spill]] }
 0x74f   : > { %s2916_s25 = sld [smem:[#allocation17_spill]]  ;;  %s2917_s21 = smov %s2315_s22 }
 0x750   : > { %s2918_s22 = smov %s2319_s23  ;;  %25 = sbr.rel (!%p23_p8) target bundleno = 12 (0xc), region = 129 }
 0x753   : > { %s2919_s23 = smov %s2914_s14 }
 0x755   :  { %1814 = vsyncpa [#allocation3], 1 }
 0x756   :  { %1816 = vsyncpa [#allocation3 + $0x1], 1 }
 0x757   :  { %1817 = vsyncpa [#allocation6], 1 }
 0x758   :  { %1819 = vsyncpa [#allocation6 + $0x1], 1 }
 0x759   :  { %1820 = vsyncpa [#allocation9], 1 }
 0x75a   :  { %1821 = vsyncpa [#allocation4], 1 }
 0x75b   :  { %1823 = vsyncpa [#allocation4 + $0x1], 1 }

</bundles_post_ra>
